<compile_context>
chip_gen: v6e
topology: v6e:2x2x1
jax: 0.10.0
libtpu: 0.0.40
codegen_flags: <defaults>
</compile_context>

<pallas_src>
import functools
import math

import jax
import jax.numpy as jnp
from jax.experimental import pallas as pl
from jax.experimental.pallas import tpu as pltpu


def _layernorm(y, gamma, beta, eps=1e-5):
    mean = jnp.mean(y, axis=-1, keepdims=True)
    var = jnp.mean((y - mean) ** 2, axis=-1, keepdims=True)
    return (y - mean) * jax.lax.rsqrt(var + eps) * gamma + beta


def _encoder_layer_kernel(
        xq_ref, xf_ref,                       # (1, TQ, D) query tile, (1, S, D) full sequence
        wq_ref, wk_ref, wv_ref,               # (H, D, dh)  bf16
        wo_ref,                               # (H, dh, D)  bf16
        bq_ref, bk_ref, bv_ref,               # (H, 1, dh)  f32
        bo_ref,                               # (1, D)      f32
        g1_ref, be1_ref,                      # (1, D)  LayerNorm 1
        w1_ref, bf1_ref,                      # (D, dff) bf16, (1, dff) f32
        w2_ref, bf2_ref,                      # (dff, D) bf16, (1, D)  f32
        g2_ref, be2_ref,                      # (1, D)  LayerNorm 2
        out_ref,                              # (1, TQ, D)
        k_sc, v_sc,                           # VMEM scratch (H, S, dh) bf16
        *, num_heads, scale):
    qi = pl.program_id(1)

    # K / V for the whole sequence: computed once per batch element and kept resident
    # in VMEM scratch across all query tiles of that batch element.
    @pl.when(qi == 0)
    def _():
        xf = xf_ref[0].astype(jnp.bfloat16)                        # (S, D)
        for h in range(num_heads):
            k_h = jnp.dot(xf, wk_ref[h], preferred_element_type=jnp.float32) + bk_ref[h]
            v_h = jnp.dot(xf, wv_ref[h], preferred_element_type=jnp.float32) + bv_ref[h]
            k_sc[h] = k_h.astype(jnp.bfloat16)
            v_sc[h] = v_h.astype(jnp.bfloat16)

    x = xq_ref[0].astype(jnp.float32)                              # (TQ, D) residual kept in f32
    x_bf = x.astype(jnp.bfloat16)

    # Multi-head attention.  Each head's (softmax(q k^T) v) is folded straight into the
    # Wo projection accumulator -> no lane-dim slicing of activations, no concatenate.
    acc = jnp.zeros(x.shape, jnp.float32)
    for h in range(num_heads):
        q_h = jnp.dot(x_bf, wq_ref[h], preferred_element_type=jnp.float32) + bq_ref[h]
        q_h = (q_h * scale).astype(jnp.bfloat16)                   # (TQ, dh)
        s = jax.lax.dot_general(                                   # q_h @ k_h^T -> (TQ, S)
            q_h, k_sc[h],
            dimension_numbers=(((1,), (1,)), ((), ())),
            preferred_element_type=jnp.float32)
        s = s - jnp.max(s, axis=-1, keepdims=True)
        p = jnp.exp(s)
        l = jnp.sum(p, axis=-1, keepdims=True)
        o_h = jnp.dot(p.astype(jnp.bfloat16), v_sc[h],
                      preferred_element_type=jnp.float32)          # (TQ, dh)
        o_h = o_h * pl.reciprocal(l, approx=True)                  # scale small output on EUP recip
        acc = acc + jnp.dot(o_h.astype(jnp.bfloat16), wo_ref[h],
                            preferred_element_type=jnp.float32)    # (TQ, D)

    attn = acc + bo_ref[...]
    x1 = _layernorm(attn + x, g1_ref[...], be1_ref[...])           # residual 1 + LN (f32)

    # Position-wise feed-forward, fused: x1 never leaves VMEM.
    h1 = jnp.dot(x1.astype(jnp.bfloat16), w1_ref[...],
                 preferred_element_type=jnp.float32) + bf1_ref[...]
    h1 = jnp.maximum(h1, 0.0)
    f = jnp.dot(h1.astype(jnp.bfloat16), w2_ref[...],
                preferred_element_type=jnp.float32) + bf2_ref[...]
    out_ref[0] = _layernorm(f + x1, g2_ref[...], be2_ref[...]).astype(out_ref.dtype)


def encoder_layer(x, params, num_heads, *, q_tile=256):
    B, S, D = x.shape
    assert D % num_heads == 0
    dh = D // num_heads
    dff = params["w1"].shape[1]

    TQ = S if S <= q_tile else q_tile
    assert S % TQ == 0, "sequence length must be divisible by the query tile"
    nq = S // TQ

    wdt = jnp.bfloat16
    # Per-head weight stacks so the kernel never slices activations along the lane dim.
    wq = params["wq"].reshape(D, num_heads, dh).transpose(1, 0, 2).astype(wdt)
    wk = params["wk"].reshape(D, num_heads, dh).transpose(1, 0, 2).astype(wdt)
    wv = params["wv"].reshape(D, num_heads, dh).transpose(1, 0, 2).astype(wdt)
    wo = params["wo"].reshape(num_heads, dh, D).astype(wdt)
    bq = params["bq"].reshape(num_heads, 1, dh)
    bk = params["bk"].reshape(num_heads, 1, dh)
    bv = params["bv"].reshape(num_heads, 1, dh)
    w1 = params["w1"].astype(wdt)
    w2 = params["w2"].astype(wdt)

    full = lambda *shape: pl.BlockSpec(shape, lambda b, q: (0,) * len(shape))
    xq_spec = pl.BlockSpec((1, TQ, D), lambda b, q: (b, q, 0))
    xf_spec = pl.BlockSpec((1, S, D), lambda b, q: (b, 0, 0))

    flops = 2 * B * S * D * (4 * D + 2 * S + 2 * dff)
    bytes_accessed = (2 * B * S * D * 4                    # activations in + out (f32)
                      + (4 * D * D + 2 * D * dff) * 2      # matmul weights (bf16)
                      + (6 * D + dff) * 4)                 # biases / LN params (f32)
    cost = pl.CostEstimate(flops=flops,
                           transcendentals=B * num_heads * S * S,
                           bytes_accessed=bytes_accessed)

    kernel = functools.partial(_encoder_layer_kernel,
                               num_heads=num_heads,
                               scale=1.0 / math.sqrt(dh))

    return pl.pallas_call(
        kernel,
        out_shape=jax.ShapeDtypeStruct((B, S, D), x.dtype),
        grid_spec=pltpu.PrefetchScalarGridSpec(
            num_scalar_prefetch=0,
            grid=(B, nq),
            in_specs=[
                xq_spec, xf_spec,
                full(num_heads, D, dh), full(num_heads, D, dh), full(num_heads, D, dh),
                full(num_heads, dh, D),
                full(num_heads, 1, dh), full(num_heads, 1, dh), full(num_heads, 1, dh),
                full(1, D),
                full(1, D), full(1, D),            # LN1 gamma / beta
                full(D, dff), full(1, dff),        # W1, b1
                full(dff, D), full(1, D),          # W2, b2
                full(1, D), full(1, D),            # LN2 gamma / beta
            ],
            out_specs=xq_spec,
            scratch_shapes=[pltpu.VMEM((num_heads, S, dh), jnp.bfloat16),
                            pltpu.VMEM((num_heads, S, dh), jnp.bfloat16)],
        ),
        compiler_params=pltpu.CompilerParams(
            dimension_semantics=("parallel", "arbitrary"),
            vmem_limit_bytes=64 * 1024 * 1024,
        ),
        cost_estimate=cost,
    )(x, x, wq, wk, wv, wo, bq, bk, bv, params["bo"],
      params["ln1_g"], params["ln1_b"],
      w1, params["b1"], w2, params["b2"],
      params["ln2_g"], params["ln2_b"])


def init_params(key, d_model, dff):
    keys = jax.random.split(key, 8)
    s = 1.0 / math.sqrt(d_model)
    sf = 1.0 / math.sqrt(dff)
    return {
        "wq": jax.random.uniform(keys[0], (d_model, d_model), jnp.float32, -s, s),
        "wk": jax.random.uniform(keys[1], (d_model, d_model), jnp.float32, -s, s),
        "wv": jax.random.uniform(keys[2], (d_model, d_model), jnp.float32, -s, s),
        "wo": jax.random.uniform(keys[3], (d_model, d_model), jnp.float32, -s, s),
        "bq": jax.random.uniform(keys[4], (1, d_model), jnp.float32, -s, s),
        "bk": jax.random.uniform(keys[5], (1, d_model), jnp.float32, -s, s),
        "bv": jax.random.uniform(keys[6], (1, d_model), jnp.float32, -s, s),
        "bo": jnp.zeros((1, d_model), jnp.float32),
        "w1": jax.random.uniform(keys[7], (d_model, dff), jnp.float32, -s, s),
        "b1": jnp.zeros((1, dff), jnp.float32),
        "w2": jax.random.uniform(jax.random.PRNGKey(123), (dff, d_model), jnp.float32, -sf, sf),
        "b2": jnp.zeros((1, d_model), jnp.float32),
        "ln1_g": jnp.ones((1, d_model), jnp.float32),
        "ln1_b": jnp.zeros((1, d_model), jnp.float32),
        "ln2_g": jnp.ones((1, d_model), jnp.float32),
        "ln2_b": jnp.zeros((1, d_model), jnp.float32),
    }


def _reference(x, p, num_heads):
    """Pure-JAX f32 reference for a sanity check."""
    B, S, D = x.shape
    dh = D // num_heads

    def ln(y, g, b, eps=1e-5):
        m = jnp.mean(y, -1, keepdims=True)
        v = jnp.mean((y - m) ** 2, -1, keepdims=True)
        return (y - m) / jnp.sqrt(v + eps) * g + b

    q = x @ p["wq"] + p["bq"]
    k = x @ p["wk"] + p["bk"]
    v = x @ p["wv"] + p["bv"]
    q = q.reshape(B, S, num_heads, dh).transpose(0, 2, 1, 3)
    k = k.reshape(B, S, num_heads, dh).transpose(0, 2, 1, 3)
    v = v.reshape(B, S, num_heads, dh).transpose(0, 2, 1, 3)
    sc = jnp.einsum("bhqd,bhkd->bhqk", q, k) / math.sqrt(dh)
    attn = jax.nn.softmax(sc, -1)
    o = jnp.einsum("bhqk,bhkd->bhqd", attn, v).transpose(0, 2, 1, 3).reshape(B, S, D)
    o = o @ p["wo"] + p["bo"]
    x1 = ln(o + x, p["ln1_g"], p["ln1_b"])
    f = jnp.maximum(x1 @ p["w1"] + p["b1"], 0.0) @ p["w2"] + p["b2"]
    return ln(f + x1, p["ln2_g"], p["ln2_b"])


if __name__ == "__main__":
    # d_model a multiple of 128 -> lane-dense tiles / stores.
    B, S, D, H, DFF = 2, 16, 128, 4, 256
    key = jax.random.PRNGKey(0)
    kx, kp = jax.random.split(key)
    x = jax.random.normal(kx, (B, S, D), jnp.float32)
    params = init_params(kp, D, DFF)

    out = jax.block_until_ready(encoder_layer(x, params, H))
    ref = _reference(x, params, H)

    assert out.shape == (B, S, D)
    err = float(jnp.max(jnp.abs(out - ref)))
    # bf16 matmul operands + approx reciprocal -> loosen f32 tolerance accordingly.
    assert jnp.allclose(out, ref, atol=5e-2, rtol=5e-2), err
    print("KERNEL_OK")
</pallas_src>

<mosaic_0001>
module attributes {stable_mosaic.version = 11 : i64} {
  func.func @_encoder_layer_kernel(%arg0: i32, %arg1: i32, %arg2: memref<1x16x128xf32, #tpu.memory_space<vmem>>, %arg3: memref<1x16x128xf32, #tpu.memory_space<vmem>>, %arg4: memref<4x128x32xbf16, #tpu.memory_space<vmem>>, %arg5: memref<4x128x32xbf16, #tpu.memory_space<vmem>>, %arg6: memref<4x128x32xbf16, #tpu.memory_space<vmem>>, %arg7: memref<4x32x128xbf16, #tpu.memory_space<vmem>>, %arg8: memref<4x1x32xf32, #tpu.memory_space<vmem>>, %arg9: memref<4x1x32xf32, #tpu.memory_space<vmem>>, %arg10: memref<4x1x32xf32, #tpu.memory_space<vmem>>, %arg11: memref<1x128xf32, #tpu.memory_space<vmem>>, %arg12: memref<1x128xf32, #tpu.memory_space<vmem>>, %arg13: memref<1x128xf32, #tpu.memory_space<vmem>>, %arg14: memref<128x256xbf16, #tpu.memory_space<vmem>>, %arg15: memref<1x256xf32, #tpu.memory_space<vmem>>, %arg16: memref<256x128xbf16, #tpu.memory_space<vmem>>, %arg17: memref<1x128xf32, #tpu.memory_space<vmem>>, %arg18: memref<1x128xf32, #tpu.memory_space<vmem>>, %arg19: memref<1x128xf32, #tpu.memory_space<vmem>>, %arg20: memref<1x16x128xf32, #tpu.memory_space<vmem>>, %arg21: memref<4x16x32xbf16, #tpu.memory_space<vmem>>, %arg22: memref<4x16x32xbf16, #tpu.memory_space<vmem>>) attributes {dimension_semantics = [#tpu.dimension_semantics<parallel>, #tpu.dimension_semantics<arbitrary>], iteration_bounds = array<i64: 2, 1>, scalar_prefetch = 0 : i64, scratch_operands = 2 : i64, tpu.core_type = #tpu.core_type<tc>, window_params = [{transform_indices = @transform_0, window_bounds = array<i64: 1, 16, 128>}, {transform_indices = @transform_1, window_bounds = array<i64: 1, 16, 128>}, {pipeline_mode = #tpu.pipeline_mode<synchronous>, transform_indices = @transform_2, window_bounds = array<i64: 4, 128, 32>}, {pipeline_mode = #tpu.pipeline_mode<synchronous>, transform_indices = @transform_3, window_bounds = array<i64: 4, 128, 32>}, {pipeline_mode = #tpu.pipeline_mode<synchronous>, transform_indices = @transform_4, window_bounds = array<i64: 4, 128, 32>}, {pipeline_mode = #tpu.pipeline_mode<synchronous>, transform_indices = @transform_5, window_bounds = array<i64: 4, 32, 128>}, {pipeline_mode = #tpu.pipeline_mode<synchronous>, transform_indices = @transform_6, window_bounds = array<i64: 4, 1, 32>}, {pipeline_mode = #tpu.pipeline_mode<synchronous>, transform_indices = @transform_7, window_bounds = array<i64: 4, 1, 32>}, {pipeline_mode = #tpu.pipeline_mode<synchronous>, transform_indices = @transform_8, window_bounds = array<i64: 4, 1, 32>}, {pipeline_mode = #tpu.pipeline_mode<synchronous>, transform_indices = @transform_9, window_bounds = array<i64: 1, 128>}, {pipeline_mode = #tpu.pipeline_mode<synchronous>, transform_indices = @transform_10, window_bounds = array<i64: 1, 128>}, {pipeline_mode = #tpu.pipeline_mode<synchronous>, transform_indices = @transform_11, window_bounds = array<i64: 1, 128>}, {pipeline_mode = #tpu.pipeline_mode<synchronous>, transform_indices = @transform_12, window_bounds = array<i64: 128, 256>}, {pipeline_mode = #tpu.pipeline_mode<synchronous>, transform_indices = @transform_13, window_bounds = array<i64: 1, 256>}, {pipeline_mode = #tpu.pipeline_mode<synchronous>, transform_indices = @transform_14, window_bounds = array<i64: 256, 128>}, {pipeline_mode = #tpu.pipeline_mode<synchronous>, transform_indices = @transform_15, window_bounds = array<i64: 1, 128>}, {pipeline_mode = #tpu.pipeline_mode<synchronous>, transform_indices = @transform_16, window_bounds = array<i64: 1, 128>}, {pipeline_mode = #tpu.pipeline_mode<synchronous>, transform_indices = @transform_17, window_bounds = array<i64: 1, 128>}, {transform_indices = @transform_18, window_bounds = array<i64: 1, 16, 128>}]} {
    %c0_i32 = arith.constant 0 : i32
    %0 = arith.cmpi eq, %arg1, %c0_i32 : i32
    %1 = arith.extui %0 : i1 to i32
    %c0_i32_0 = arith.constant 0 : i32
    %2 = arith.cmpi ne, %1, %c0_i32_0 : i32
    scf.if %2 {
      %c0_122 = arith.constant 0 : index
      %c0_123 = arith.constant 0 : index
      %c0_124 = arith.constant 0 : index
      %205 = vector.load %arg3[%c0_122, %c0_123, %c0_124] : memref<1x16x128xf32, #tpu.memory_space<vmem>>, vector<1x16x128xf32>
      %206 = vector.shape_cast %205 : vector<1x16x128xf32> to vector<16x128xf32>
      %207 = arith.truncf %206 : vector<16x128xf32> to vector<16x128xbf16>
      %c0_125 = arith.constant 0 : index
      %c0_126 = arith.constant 0 : index
      %c0_127 = arith.constant 0 : index
      %208 = vector.load %arg5[%c0_125, %c0_126, %c0_127] : memref<4x128x32xbf16, #tpu.memory_space<vmem>>, vector<1x128x32xbf16>
      %209 = vector.shape_cast %208 : vector<1x128x32xbf16> to vector<128x32xbf16>
      %cst_128 = arith.constant dense<0.000000e+00> : vector<16x32xf32>
      %210 = tpu.matmul %207, %209, %cst_128 {dimension_numbers = #tpu.dot_dimension_numbers<[1], [0], [0], [1], [0, 0, 1, 1], [], []>} : vector<16x128xbf16>, vector<128x32xbf16>, vector<16x32xf32> -> vector<16x32xf32>
      %c0_129 = arith.constant 0 : index
      %c0_130 = arith.constant 0 : index
      %c0_131 = arith.constant 0 : index
      %211 = vector.load %arg9[%c0_129, %c0_130, %c0_131] : memref<4x1x32xf32, #tpu.memory_space<vmem>>, vector<1x1x32xf32>
      %212 = vector.shape_cast %211 : vector<1x1x32xf32> to vector<1x32xf32>
      %213 = vector.broadcast %212 : vector<1x32xf32> to vector<16x32xf32>
      %214 = arith.addf %210, %213 : vector<16x32xf32>
      %c0_132 = arith.constant 0 : index
      %c0_133 = arith.constant 0 : index
      %c0_134 = arith.constant 0 : index
      %215 = vector.load %arg6[%c0_132, %c0_133, %c0_134] : memref<4x128x32xbf16, #tpu.memory_space<vmem>>, vector<1x128x32xbf16>
      %216 = vector.shape_cast %215 : vector<1x128x32xbf16> to vector<128x32xbf16>
      %cst_135 = arith.constant dense<0.000000e+00> : vector<16x32xf32>
      %217 = tpu.matmul %207, %216, %cst_135 {dimension_numbers = #tpu.dot_dimension_numbers<[1], [0], [0], [1], [0, 0, 1, 1], [], []>} : vector<16x128xbf16>, vector<128x32xbf16>, vector<16x32xf32> -> vector<16x32xf32>
      %c0_136 = arith.constant 0 : index
      %c0_137 = arith.constant 0 : index
      %c0_138 = arith.constant 0 : index
      %218 = vector.load %arg10[%c0_136, %c0_137, %c0_138] : memref<4x1x32xf32, #tpu.memory_space<vmem>>, vector<1x1x32xf32>
      %219 = vector.shape_cast %218 : vector<1x1x32xf32> to vector<1x32xf32>
      %220 = vector.broadcast %219 : vector<1x32xf32> to vector<16x32xf32>
      %221 = arith.addf %217, %220 : vector<16x32xf32>
      %222 = arith.truncf %214 : vector<16x32xf32> to vector<16x32xbf16>
      %c0_139 = arith.constant 0 : index
      %c0_140 = arith.constant 0 : index
      %c0_141 = arith.constant 0 : index
      %223 = vector.load %arg21[%c0_139, %c0_140, %c0_141] : memref<4x16x32xbf16, #tpu.memory_space<vmem>>, vector<1x16x32xbf16>
      %224 = vector.shape_cast %223 : vector<1x16x32xbf16> to vector<16x32xbf16>
      %225 = vector.shape_cast %222 : vector<16x32xbf16> to vector<1x16x32xbf16>
      tpu.vector_store %arg21[%c0_139, %c0_140, %c0_141], %225 {strides = array<i32>} : memref<4x16x32xbf16, #tpu.memory_space<vmem>>, vector<1x16x32xbf16>,
      %226 = arith.truncf %221 : vector<16x32xf32> to vector<16x32xbf16>
      %c0_142 = arith.constant 0 : index
      %c0_143 = arith.constant 0 : index
      %c0_144 = arith.constant 0 : index
      %227 = vector.load %arg22[%c0_142, %c0_143, %c0_144] : memref<4x16x32xbf16, #tpu.memory_space<vmem>>, vector<1x16x32xbf16>
      %228 = vector.shape_cast %227 : vector<1x16x32xbf16> to vector<16x32xbf16>
      %229 = vector.shape_cast %226 : vector<16x32xbf16> to vector<1x16x32xbf16>
      tpu.vector_store %arg22[%c0_142, %c0_143, %c0_144], %229 {strides = array<i32>} : memref<4x16x32xbf16, #tpu.memory_space<vmem>>, vector<1x16x32xbf16>,
      %c1_145 = arith.constant 1 : index
      %c0_146 = arith.constant 0 : index
      %c0_147 = arith.constant 0 : index
      %230 = vector.load %arg5[%c1_145, %c0_146, %c0_147] : memref<4x128x32xbf16, #tpu.memory_space<vmem>>, vector<1x128x32xbf16>
      %231 = vector.shape_cast %230 : vector<1x128x32xbf16> to vector<128x32xbf16>
      %cst_148 = arith.constant dense<0.000000e+00> : vector<16x32xf32>
      %232 = tpu.matmul %207, %231, %cst_148 {dimension_numbers = #tpu.dot_dimension_numbers<[1], [0], [0], [1], [0, 0, 1, 1], [], []>} : vector<16x128xbf16>, vector<128x32xbf16>, vector<16x32xf32> -> vector<16x32xf32>
      %c1_149 = arith.constant 1 : index
      %c0_150 = arith.constant 0 : index
      %c0_151 = arith.constant 0 : index
      %233 = vector.load %arg9[%c1_149, %c0_150, %c0_151] : memref<4x1x32xf32, #tpu.memory_space<vmem>>, vector<1x1x32xf32>
      %234 = vector.shape_cast %233 : vector<1x1x32xf32> to vector<1x32xf32>
      %235 = vector.broadcast %234 : vector<1x32xf32> to vector<16x32xf32>
      %236 = arith.addf %232, %235 : vector<16x32xf32>
      %c1_152 = arith.constant 1 : index
      %c0_153 = arith.constant 0 : index
      %c0_154 = arith.constant 0 : index
      %237 = vector.load %arg6[%c1_152, %c0_153, %c0_154] : memref<4x128x32xbf16, #tpu.memory_space<vmem>>, vector<1x128x32xbf16>
      %238 = vector.shape_cast %237 : vector<1x128x32xbf16> to vector<128x32xbf16>
      %cst_155 = arith.constant dense<0.000000e+00> : vector<16x32xf32>
      %239 = tpu.matmul %207, %238, %cst_155 {dimension_numbers = #tpu.dot_dimension_numbers<[1], [0], [0], [1], [0, 0, 1, 1], [], []>} : vector<16x128xbf16>, vector<128x32xbf16>, vector<16x32xf32> -> vector<16x32xf32>
      %c1_156 = arith.constant 1 : index
      %c0_157 = arith.constant 0 : index
      %c0_158 = arith.constant 0 : index
      %240 = vector.load %arg10[%c1_156, %c0_157, %c0_158] : memref<4x1x32xf32, #tpu.memory_space<vmem>>, vector<1x1x32xf32>
      %241 = vector.shape_cast %240 : vector<1x1x32xf32> to vector<1x32xf32>
      %242 = vector.broadcast %241 : vector<1x32xf32> to vector<16x32xf32>
      %243 = arith.addf %239, %242 : vector<16x32xf32>
      %244 = arith.truncf %236 : vector<16x32xf32> to vector<16x32xbf16>
      %c1_159 = arith.constant 1 : index
      %c0_160 = arith.constant 0 : index
      %c0_161 = arith.constant 0 : index
      %245 = vector.load %arg21[%c1_159, %c0_160, %c0_161] : memref<4x16x32xbf16, #tpu.memory_space<vmem>>, vector<1x16x32xbf16>
      %246 = vector.shape_cast %245 : vector<1x16x32xbf16> to vector<16x32xbf16>
      %247 = vector.shape_cast %244 : vector<16x32xbf16> to vector<1x16x32xbf16>
      tpu.vector_store %arg21[%c1_159, %c0_160, %c0_161], %247 {strides = array<i32>} : memref<4x16x32xbf16, #tpu.memory_space<vmem>>, vector<1x16x32xbf16>,
      %248 = arith.truncf %243 : vector<16x32xf32> to vector<16x32xbf16>
      %c1_162 = arith.constant 1 : index
      %c0_163 = arith.constant 0 : index
      %c0_164 = arith.constant 0 : index
      %249 = vector.load %arg22[%c1_162, %c0_163, %c0_164] : memref<4x16x32xbf16, #tpu.memory_space<vmem>>, vector<1x16x32xbf16>
      %250 = vector.shape_cast %249 : vector<1x16x32xbf16> to vector<16x32xbf16>
      %251 = vector.shape_cast %248 : vector<16x32xbf16> to vector<1x16x32xbf16>
      tpu.vector_store %arg22[%c1_162, %c0_163, %c0_164], %251 {strides = array<i32>} : memref<4x16x32xbf16, #tpu.memory_space<vmem>>, vector<1x16x32xbf16>,
      %c2_165 = arith.constant 2 : index
      %c0_166 = arith.constant 0 : index
      %c0_167 = arith.constant 0 : index
      %252 = vector.load %arg5[%c2_165, %c0_166, %c0_167] : memref<4x128x32xbf16, #tpu.memory_space<vmem>>, vector<1x128x32xbf16>
      %253 = vector.shape_cast %252 : vector<1x128x32xbf16> to vector<128x32xbf16>
      %cst_168 = arith.constant dense<0.000000e+00> : vector<16x32xf32>
      %254 = tpu.matmul %207, %253, %cst_168 {dimension_numbers = #tpu.dot_dimension_numbers<[1], [0], [0], [1], [0, 0, 1, 1], [], []>} : vector<16x128xbf16>, vector<128x32xbf16>, vector<16x32xf32> -> vector<16x32xf32>
      %c2_169 = arith.constant 2 : index
      %c0_170 = arith.constant 0 : index
      %c0_171 = arith.constant 0 : index
      %255 = vector.load %arg9[%c2_169, %c0_170, %c0_171] : memref<4x1x32xf32, #tpu.memory_space<vmem>>, vector<1x1x32xf32>
      %256 = vector.shape_cast %255 : vector<1x1x32xf32> to vector<1x32xf32>
      %257 = vector.broadcast %256 : vector<1x32xf32> to vector<16x32xf32>
      %258 = arith.addf %254, %257 : vector<16x32xf32>
      %c2_172 = arith.constant 2 : index
      %c0_173 = arith.constant 0 : index
      %c0_174 = arith.constant 0 : index
      %259 = vector.load %arg6[%c2_172, %c0_173, %c0_174] : memref<4x128x32xbf16, #tpu.memory_space<vmem>>, vector<1x128x32xbf16>
      %260 = vector.shape_cast %259 : vector<1x128x32xbf16> to vector<128x32xbf16>
      %cst_175 = arith.constant dense<0.000000e+00> : vector<16x32xf32>
      %261 = tpu.matmul %207, %260, %cst_175 {dimension_numbers = #tpu.dot_dimension_numbers<[1], [0], [0], [1], [0, 0, 1, 1], [], []>} : vector<16x128xbf16>, vector<128x32xbf16>, vector<16x32xf32> -> vector<16x32xf32>
      %c2_176 = arith.constant 2 : index
      %c0_177 = arith.constant 0 : index
      %c0_178 = arith.constant 0 : index
      %262 = vector.load %arg10[%c2_176, %c0_177, %c0_178] : memref<4x1x32xf32, #tpu.memory_space<vmem>>, vector<1x1x32xf32>
      %263 = vector.shape_cast %262 : vector<1x1x32xf32> to vector<1x32xf32>
      %264 = vector.broadcast %263 : vector<1x32xf32> to vector<16x32xf32>
      %265 = arith.addf %261, %264 : vector<16x32xf32>
      %266 = arith.truncf %258 : vector<16x32xf32> to vector<16x32xbf16>
      %c2_179 = arith.constant 2 : index
      %c0_180 = arith.constant 0 : index
      %c0_181 = arith.constant 0 : index
      %267 = vector.load %arg21[%c2_179, %c0_180, %c0_181] : memref<4x16x32xbf16, #tpu.memory_space<vmem>>, vector<1x16x32xbf16>
      %268 = vector.shape_cast %267 : vector<1x16x32xbf16> to vector<16x32xbf16>
      %269 = vector.shape_cast %266 : vector<16x32xbf16> to vector<1x16x32xbf16>
      tpu.vector_store %arg21[%c2_179, %c0_180, %c0_181], %269 {strides = array<i32>} : memref<4x16x32xbf16, #tpu.memory_space<vmem>>, vector<1x16x32xbf16>,
      %270 = arith.truncf %265 : vector<16x32xf32> to vector<16x32xbf16>
      %c2_182 = arith.constant 2 : index
      %c0_183 = arith.constant 0 : index
      %c0_184 = arith.constant 0 : index
      %271 = vector.load %arg22[%c2_182, %c0_183, %c0_184] : memref<4x16x32xbf16, #tpu.memory_space<vmem>>, vector<1x16x32xbf16>
      %272 = vector.shape_cast %271 : vector<1x16x32xbf16> to vector<16x32xbf16>
      %273 = vector.shape_cast %270 : vector<16x32xbf16> to vector<1x16x32xbf16>
      tpu.vector_store %arg22[%c2_182, %c0_183, %c0_184], %273 {strides = array<i32>} : memref<4x16x32xbf16, #tpu.memory_space<vmem>>, vector<1x16x32xbf16>,
      %c3_185 = arith.constant 3 : index
      %c0_186 = arith.constant 0 : index
      %c0_187 = arith.constant 0 : index
      %274 = vector.load %arg5[%c3_185, %c0_186, %c0_187] : memref<4x128x32xbf16, #tpu.memory_space<vmem>>, vector<1x128x32xbf16>
      %275 = vector.shape_cast %274 : vector<1x128x32xbf16> to vector<128x32xbf16>
      %cst_188 = arith.constant dense<0.000000e+00> : vector<16x32xf32>
      %276 = tpu.matmul %207, %275, %cst_188 {dimension_numbers = #tpu.dot_dimension_numbers<[1], [0], [0], [1], [0, 0, 1, 1], [], []>} : vector<16x128xbf16>, vector<128x32xbf16>, vector<16x32xf32> -> vector<16x32xf32>
      %c3_189 = arith.constant 3 : index
      %c0_190 = arith.constant 0 : index
      %c0_191 = arith.constant 0 : index
      %277 = vector.load %arg9[%c3_189, %c0_190, %c0_191] : memref<4x1x32xf32, #tpu.memory_space<vmem>>, vector<1x1x32xf32>
      %278 = vector.shape_cast %277 : vector<1x1x32xf32> to vector<1x32xf32>
      %279 = vector.broadcast %278 : vector<1x32xf32> to vector<16x32xf32>
      %280 = arith.addf %276, %279 : vector<16x32xf32>
      %c3_192 = arith.constant 3 : index
      %c0_193 = arith.constant 0 : index
      %c0_194 = arith.constant 0 : index
      %281 = vector.load %arg6[%c3_192, %c0_193, %c0_194] : memref<4x128x32xbf16, #tpu.memory_space<vmem>>, vector<1x128x32xbf16>
      %282 = vector.shape_cast %281 : vector<1x128x32xbf16> to vector<128x32xbf16>
      %cst_195 = arith.constant dense<0.000000e+00> : vector<16x32xf32>
      %283 = tpu.matmul %207, %282, %cst_195 {dimension_numbers = #tpu.dot_dimension_numbers<[1], [0], [0], [1], [0, 0, 1, 1], [], []>} : vector<16x128xbf16>, vector<128x32xbf16>, vector<16x32xf32> -> vector<16x32xf32>
      %c3_196 = arith.constant 3 : index
      %c0_197 = arith.constant 0 : index
      %c0_198 = arith.constant 0 : index
      %284 = vector.load %arg10[%c3_196, %c0_197, %c0_198] : memref<4x1x32xf32, #tpu.memory_space<vmem>>, vector<1x1x32xf32>
      %285 = vector.shape_cast %284 : vector<1x1x32xf32> to vector<1x32xf32>
      %286 = vector.broadcast %285 : vector<1x32xf32> to vector<16x32xf32>
      %287 = arith.addf %283, %286 : vector<16x32xf32>
      %288 = arith.truncf %280 : vector<16x32xf32> to vector<16x32xbf16>
      %c3_199 = arith.constant 3 : index
      %c0_200 = arith.constant 0 : index
      %c0_201 = arith.constant 0 : index
      %289 = vector.load %arg21[%c3_199, %c0_200, %c0_201] : memref<4x16x32xbf16, #tpu.memory_space<vmem>>, vector<1x16x32xbf16>
      %290 = vector.shape_cast %289 : vector<1x16x32xbf16> to vector<16x32xbf16>
      %291 = vector.shape_cast %288 : vector<16x32xbf16> to vector<1x16x32xbf16>
      tpu.vector_store %arg21[%c3_199, %c0_200, %c0_201], %291 {strides = array<i32>} : memref<4x16x32xbf16, #tpu.memory_space<vmem>>, vector<1x16x32xbf16>,
      %292 = arith.truncf %287 : vector<16x32xf32> to vector<16x32xbf16>
      %c3_202 = arith.constant 3 : index
      %c0_203 = arith.constant 0 : index
      %c0_204 = arith.constant 0 : index
      %293 = vector.load %arg22[%c3_202, %c0_203, %c0_204] : memref<4x16x32xbf16, #tpu.memory_space<vmem>>, vector<1x16x32xbf16>
      %294 = vector.shape_cast %293 : vector<1x16x32xbf16> to vector<16x32xbf16>
      %295 = vector.shape_cast %292 : vector<16x32xbf16> to vector<1x16x32xbf16>
      tpu.vector_store %arg22[%c3_202, %c0_203, %c0_204], %295 {strides = array<i32>} : memref<4x16x32xbf16, #tpu.memory_space<vmem>>, vector<1x16x32xbf16>,
    } else {
    }
    %c0 = arith.constant 0 : index
    %c0_1 = arith.constant 0 : index
    %c0_2 = arith.constant 0 : index
    %3 = vector.load %arg2[%c0, %c0_1, %c0_2] : memref<1x16x128xf32, #tpu.memory_space<vmem>>, vector<1x16x128xf32>
    %4 = vector.shape_cast %3 : vector<1x16x128xf32> to vector<16x128xf32>
    %5 = arith.truncf %4 : vector<16x128xf32> to vector<16x128xbf16>
    %cst = arith.constant 0.000000e+00 : f32
    %6 = vector.broadcast %cst : f32 to vector<16x128xf32>
    %c0_3 = arith.constant 0 : index
    %c0_4 = arith.constant 0 : index
    %c0_5 = arith.constant 0 : index
    %7 = vector.load %arg4[%c0_3, %c0_4, %c0_5] : memref<4x128x32xbf16, #tpu.memory_space<vmem>>, vector<1x128x32xbf16>
    %8 = vector.shape_cast %7 : vector<1x128x32xbf16> to vector<128x32xbf16>
    %cst_6 = arith.constant dense<0.000000e+00> : vector<16x32xf32>
    %9 = tpu.matmul %5, %8, %cst_6 {dimension_numbers = #tpu.dot_dimension_numbers<[1], [0], [0], [1], [0, 0, 1, 1], [], []>} : vector<16x128xbf16>, vector<128x32xbf16>, vector<16x32xf32> -> vector<16x32xf32>
    %c0_7 = arith.constant 0 : index
    %c0_8 = arith.constant 0 : index
    %c0_9 = arith.constant 0 : index
    %10 = vector.load %arg8[%c0_7, %c0_8, %c0_9] : memref<4x1x32xf32, #tpu.memory_space<vmem>>, vector<1x1x32xf32>
    %11 = vector.shape_cast %10 : vector<1x1x32xf32> to vector<1x32xf32>
    %12 = vector.broadcast %11 : vector<1x32xf32> to vector<16x32xf32>
    %13 = arith.addf %9, %12 : vector<16x32xf32>
    %cst_10 = arith.constant 0.176776692 : f32
    %14 = vector.broadcast %cst_10 : f32 to vector<16x32xf32>
    %15 = arith.mulf %13, %14 : vector<16x32xf32>
    %16 = arith.truncf %15 : vector<16x32xf32> to vector<16x32xbf16>
    %c0_11 = arith.constant 0 : index
    %c0_12 = arith.constant 0 : index
    %c0_13 = arith.constant 0 : index
    %17 = vector.load %arg21[%c0_11, %c0_12, %c0_13] : memref<4x16x32xbf16, #tpu.memory_space<vmem>>, vector<1x16x32xbf16>
    %18 = vector.shape_cast %17 : vector<1x16x32xbf16> to vector<16x32xbf16>
    %cst_14 = arith.constant dense<0.000000e+00> : vector<16x16xf32>
    %19 = tpu.matmul %16, %18, %cst_14 {dimension_numbers = #tpu.dot_dimension_numbers<[1], [1], [0], [0], [0, 0, 1, 0], [], []>} : vector<16x32xbf16>, vector<16x32xbf16>, vector<16x16xf32> -> vector<16x16xf32>
    %cst_15 = arith.constant dense<0xFF800000> : vector<16xf32>
    %20 = vector.multi_reduction <maximumf>, %19, %cst_15 [1] : vector<16x16xf32> to vector<16xf32>
    %21 = vector.shape_cast %20 : vector<16xf32> to vector<16x1xf32>
    %22 = vector.broadcast %21 : vector<16x1xf32> to vector<16x16xf32>
    %23 = arith.subf %19, %22 : vector<16x16xf32>
    %24 = math.exp %23 : vector<16x16xf32>
    %cst_16 = arith.constant dense<0.000000e+00> : vector<16xf32>
    %25 = vector.multi_reduction <add>, %24, %cst_16 [1] : vector<16x16xf32> to vector<16xf32>
    %26 = vector.shape_cast %25 : vector<16xf32> to vector<16x1xf32>
    %27 = arith.truncf %24 : vector<16x16xf32> to vector<16x16xbf16>
    %c0_17 = arith.constant 0 : index
    %c0_18 = arith.constant 0 : index
    %c0_19 = arith.constant 0 : index
    %28 = vector.load %arg22[%c0_17, %c0_18, %c0_19] : memref<4x16x32xbf16, #tpu.memory_space<vmem>>, vector<1x16x32xbf16>
    %29 = vector.shape_cast %28 : vector<1x16x32xbf16> to vector<16x32xbf16>
    %cst_20 = arith.constant dense<0.000000e+00> : vector<16x32xf32>
    %30 = tpu.matmul %27, %29, %cst_20 {dimension_numbers = #tpu.dot_dimension_numbers<[1], [0], [0], [1], [0, 0, 1, 1], [], []>} : vector<16x16xbf16>, vector<16x32xbf16>, vector<16x32xf32> -> vector<16x32xf32>
    %31 = tpu.reciprocal %26 {approx = true} : vector<16x1xf32> -> vector<16x1xf32>
    %32 = vector.broadcast %31 : vector<16x1xf32> to vector<16x32xf32>
    %33 = arith.mulf %30, %32 : vector<16x32xf32>
    %34 = arith.truncf %33 : vector<16x32xf32> to vector<16x32xbf16>
    %c0_21 = arith.constant 0 : index
    %c0_22 = arith.constant 0 : index
    %c0_23 = arith.constant 0 : index
    %35 = vector.load %arg7[%c0_21, %c0_22, %c0_23] : memref<4x32x128xbf16, #tpu.memory_space<vmem>>, vector<1x32x128xbf16>
    %36 = vector.shape_cast %35 : vector<1x32x128xbf16> to vector<32x128xbf16>
    %cst_24 = arith.constant dense<0.000000e+00> : vector<16x128xf32>
    %37 = tpu.matmul %34, %36, %cst_24 {dimension_numbers = #tpu.dot_dimension_numbers<[1], [0], [0], [1], [0, 0, 1, 1], [], []>} : vector<16x32xbf16>, vector<32x128xbf16>, vector<16x128xf32> -> vector<16x128xf32>
    %38 = arith.addf %6, %37 : vector<16x128xf32>
    %c1 = arith.constant 1 : index
    %c0_25 = arith.constant 0 : index
    %c0_26 = arith.constant 0 : index
    %39 = vector.load %arg4[%c1, %c0_25, %c0_26] : memref<4x128x32xbf16, #tpu.memory_space<vmem>>, vector<1x128x32xbf16>
    %40 = vector.shape_cast %39 : vector<1x128x32xbf16> to vector<128x32xbf16>
    %cst_27 = arith.constant dense<0.000000e+00> : vector<16x32xf32>
    %41 = tpu.matmul %5, %40, %cst_27 {dimension_numbers = #tpu.dot_dimension_numbers<[1], [0], [0], [1], [0, 0, 1, 1], [], []>} : vector<16x128xbf16>, vector<128x32xbf16>, vector<16x32xf32> -> vector<16x32xf32>
    %c1_28 = arith.constant 1 : index
    %c0_29 = arith.constant 0 : index
    %c0_30 = arith.constant 0 : index
    %42 = vector.load %arg8[%c1_28, %c0_29, %c0_30] : memref<4x1x32xf32, #tpu.memory_space<vmem>>, vector<1x1x32xf32>
    %43 = vector.shape_cast %42 : vector<1x1x32xf32> to vector<1x32xf32>
    %44 = vector.broadcast %43 : vector<1x32xf32> to vector<16x32xf32>
    %45 = arith.addf %41, %44 : vector<16x32xf32>
    %cst_31 = arith.constant 0.176776692 : f32
    %46 = vector.broadcast %cst_31 : f32 to vector<16x32xf32>
    %47 = arith.mulf %45, %46 : vector<16x32xf32>
    %48 = arith.truncf %47 : vector<16x32xf32> to vector<16x32xbf16>
    %c1_32 = arith.constant 1 : index
    %c0_33 = arith.constant 0 : index
    %c0_34 = arith.constant 0 : index
    %49 = vector.load %arg21[%c1_32, %c0_33, %c0_34] : memref<4x16x32xbf16, #tpu.memory_space<vmem>>, vector<1x16x32xbf16>
    %50 = vector.shape_cast %49 : vector<1x16x32xbf16> to vector<16x32xbf16>
    %cst_35 = arith.constant dense<0.000000e+00> : vector<16x16xf32>
    %51 = tpu.matmul %48, %50, %cst_35 {dimension_numbers = #tpu.dot_dimension_numbers<[1], [1], [0], [0], [0, 0, 1, 0], [], []>} : vector<16x32xbf16>, vector<16x32xbf16>, vector<16x16xf32> -> vector<16x16xf32>
    %cst_36 = arith.constant dense<0xFF800000> : vector<16xf32>
    %52 = vector.multi_reduction <maximumf>, %51, %cst_36 [1] : vector<16x16xf32> to vector<16xf32>
    %53 = vector.shape_cast %52 : vector<16xf32> to vector<16x1xf32>
    %54 = vector.broadcast %53 : vector<16x1xf32> to vector<16x16xf32>
    %55 = arith.subf %51, %54 : vector<16x16xf32>
    %56 = math.exp %55 : vector<16x16xf32>
    %cst_37 = arith.constant dense<0.000000e+00> : vector<16xf32>
    %57 = vector.multi_reduction <add>, %56, %cst_37 [1] : vector<16x16xf32> to vector<16xf32>
    %58 = vector.shape_cast %57 : vector<16xf32> to vector<16x1xf32>
    %59 = arith.truncf %56 : vector<16x16xf32> to vector<16x16xbf16>
    %c1_38 = arith.constant 1 : index
    %c0_39 = arith.constant 0 : index
    %c0_40 = arith.constant 0 : index
    %60 = vector.load %arg22[%c1_38, %c0_39, %c0_40] : memref<4x16x32xbf16, #tpu.memory_space<vmem>>, vector<1x16x32xbf16>
    %61 = vector.shape_cast %60 : vector<1x16x32xbf16> to vector<16x32xbf16>
    %cst_41 = arith.constant dense<0.000000e+00> : vector<16x32xf32>
    %62 = tpu.matmul %59, %61, %cst_41 {dimension_numbers = #tpu.dot_dimension_numbers<[1], [0], [0], [1], [0, 0, 1, 1], [], []>} : vector<16x16xbf16>, vector<16x32xbf16>, vector<16x32xf32> -> vector<16x32xf32>
    %63 = tpu.reciprocal %58 {approx = true} : vector<16x1xf32> -> vector<16x1xf32>
    %64 = vector.broadcast %63 : vector<16x1xf32> to vector<16x32xf32>
    %65 = arith.mulf %62, %64 : vector<16x32xf32>
    %66 = arith.truncf %65 : vector<16x32xf32> to vector<16x32xbf16>
    %c1_42 = arith.constant 1 : index
    %c0_43 = arith.constant 0 : index
    %c0_44 = arith.constant 0 : index
    %67 = vector.load %arg7[%c1_42, %c0_43, %c0_44] : memref<4x32x128xbf16, #tpu.memory_space<vmem>>, vector<1x32x128xbf16>
    %68 = vector.shape_cast %67 : vector<1x32x128xbf16> to vector<32x128xbf16>
    %cst_45 = arith.constant dense<0.000000e+00> : vector<16x128xf32>
    %69 = tpu.matmul %66, %68, %cst_45 {dimension_numbers = #tpu.dot_dimension_numbers<[1], [0], [0], [1], [0, 0, 1, 1], [], []>} : vector<16x32xbf16>, vector<32x128xbf16>, vector<16x128xf32> -> vector<16x128xf32>
    %70 = arith.addf %38, %69 : vector<16x128xf32>
    %c2 = arith.constant 2 : index
    %c0_46 = arith.constant 0 : index
    %c0_47 = arith.constant 0 : index
    %71 = vector.load %arg4[%c2, %c0_46, %c0_47] : memref<4x128x32xbf16, #tpu.memory_space<vmem>>, vector<1x128x32xbf16>
    %72 = vector.shape_cast %71 : vector<1x128x32xbf16> to vector<128x32xbf16>
    %cst_48 = arith.constant dense<0.000000e+00> : vector<16x32xf32>
    %73 = tpu.matmul %5, %72, %cst_48 {dimension_numbers = #tpu.dot_dimension_numbers<[1], [0], [0], [1], [0, 0, 1, 1], [], []>} : vector<16x128xbf16>, vector<128x32xbf16>, vector<16x32xf32> -> vector<16x32xf32>
    %c2_49 = arith.constant 2 : index
    %c0_50 = arith.constant 0 : index
    %c0_51 = arith.constant 0 : index
    %74 = vector.load %arg8[%c2_49, %c0_50, %c0_51] : memref<4x1x32xf32, #tpu.memory_space<vmem>>, vector<1x1x32xf32>
    %75 = vector.shape_cast %74 : vector<1x1x32xf32> to vector<1x32xf32>
    %76 = vector.broadcast %75 : vector<1x32xf32> to vector<16x32xf32>
    %77 = arith.addf %73, %76 : vector<16x32xf32>
    %cst_52 = arith.constant 0.176776692 : f32
    %78 = vector.broadcast %cst_52 : f32 to vector<16x32xf32>
    %79 = arith.mulf %77, %78 : vector<16x32xf32>
    %80 = arith.truncf %79 : vector<16x32xf32> to vector<16x32xbf16>
    %c2_53 = arith.constant 2 : index
    %c0_54 = arith.constant 0 : index
    %c0_55 = arith.constant 0 : index
    %81 = vector.load %arg21[%c2_53, %c0_54, %c0_55] : memref<4x16x32xbf16, #tpu.memory_space<vmem>>, vector<1x16x32xbf16>
    %82 = vector.shape_cast %81 : vector<1x16x32xbf16> to vector<16x32xbf16>
    %cst_56 = arith.constant dense<0.000000e+00> : vector<16x16xf32>
    %83 = tpu.matmul %80, %82, %cst_56 {dimension_numbers = #tpu.dot_dimension_numbers<[1], [1], [0], [0], [0, 0, 1, 0], [], []>} : vector<16x32xbf16>, vector<16x32xbf16>, vector<16x16xf32> -> vector<16x16xf32>
    %cst_57 = arith.constant dense<0xFF800000> : vector<16xf32>
    %84 = vector.multi_reduction <maximumf>, %83, %cst_57 [1] : vector<16x16xf32> to vector<16xf32>
    %85 = vector.shape_cast %84 : vector<16xf32> to vector<16x1xf32>
    %86 = vector.broadcast %85 : vector<16x1xf32> to vector<16x16xf32>
    %87 = arith.subf %83, %86 : vector<16x16xf32>
    %88 = math.exp %87 : vector<16x16xf32>
    %cst_58 = arith.constant dense<0.000000e+00> : vector<16xf32>
    %89 = vector.multi_reduction <add>, %88, %cst_58 [1] : vector<16x16xf32> to vector<16xf32>
    %90 = vector.shape_cast %89 : vector<16xf32> to vector<16x1xf32>
    %91 = arith.truncf %88 : vector<16x16xf32> to vector<16x16xbf16>
    %c2_59 = arith.constant 2 : index
    %c0_60 = arith.constant 0 : index
    %c0_61 = arith.constant 0 : index
    %92 = vector.load %arg22[%c2_59, %c0_60, %c0_61] : memref<4x16x32xbf16, #tpu.memory_space<vmem>>, vector<1x16x32xbf16>
    %93 = vector.shape_cast %92 : vector<1x16x32xbf16> to vector<16x32xbf16>
    %cst_62 = arith.constant dense<0.000000e+00> : vector<16x32xf32>
    %94 = tpu.matmul %91, %93, %cst_62 {dimension_numbers = #tpu.dot_dimension_numbers<[1], [0], [0], [1], [0, 0, 1, 1], [], []>} : vector<16x16xbf16>, vector<16x32xbf16>, vector<16x32xf32> -> vector<16x32xf32>
    %95 = tpu.reciprocal %90 {approx = true} : vector<16x1xf32> -> vector<16x1xf32>
    %96 = vector.broadcast %95 : vector<16x1xf32> to vector<16x32xf32>
    %97 = arith.mulf %94, %96 : vector<16x32xf32>
    %98 = arith.truncf %97 : vector<16x32xf32> to vector<16x32xbf16>
    %c2_63 = arith.constant 2 : index
    %c0_64 = arith.constant 0 : index
    %c0_65 = arith.constant 0 : index
    %99 = vector.load %arg7[%c2_63, %c0_64, %c0_65] : memref<4x32x128xbf16, #tpu.memory_space<vmem>>, vector<1x32x128xbf16>
    %100 = vector.shape_cast %99 : vector<1x32x128xbf16> to vector<32x128xbf16>
    %cst_66 = arith.constant dense<0.000000e+00> : vector<16x128xf32>
    %101 = tpu.matmul %98, %100, %cst_66 {dimension_numbers = #tpu.dot_dimension_numbers<[1], [0], [0], [1], [0, 0, 1, 1], [], []>} : vector<16x32xbf16>, vector<32x128xbf16>, vector<16x128xf32> -> vector<16x128xf32>
    %102 = arith.addf %70, %101 : vector<16x128xf32>
    %c3 = arith.constant 3 : index
    %c0_67 = arith.constant 0 : index
    %c0_68 = arith.constant 0 : index
    %103 = vector.load %arg4[%c3, %c0_67, %c0_68] : memref<4x128x32xbf16, #tpu.memory_space<vmem>>, vector<1x128x32xbf16>
    %104 = vector.shape_cast %103 : vector<1x128x32xbf16> to vector<128x32xbf16>
    %cst_69 = arith.constant dense<0.000000e+00> : vector<16x32xf32>
    %105 = tpu.matmul %5, %104, %cst_69 {dimension_numbers = #tpu.dot_dimension_numbers<[1], [0], [0], [1], [0, 0, 1, 1], [], []>} : vector<16x128xbf16>, vector<128x32xbf16>, vector<16x32xf32> -> vector<16x32xf32>
    %c3_70 = arith.constant 3 : index
    %c0_71 = arith.constant 0 : index
    %c0_72 = arith.constant 0 : index
    %106 = vector.load %arg8[%c3_70, %c0_71, %c0_72] : memref<4x1x32xf32, #tpu.memory_space<vmem>>, vector<1x1x32xf32>
    %107 = vector.shape_cast %106 : vector<1x1x32xf32> to vector<1x32xf32>
    %108 = vector.broadcast %107 : vector<1x32xf32> to vector<16x32xf32>
    %109 = arith.addf %105, %108 : vector<16x32xf32>
    %cst_73 = arith.constant 0.176776692 : f32
    %110 = vector.broadcast %cst_73 : f32 to vector<16x32xf32>
    %111 = arith.mulf %109, %110 : vector<16x32xf32>
    %112 = arith.truncf %111 : vector<16x32xf32> to vector<16x32xbf16>
    %c3_74 = arith.constant 3 : index
    %c0_75 = arith.constant 0 : index
    %c0_76 = arith.constant 0 : index
    %113 = vector.load %arg21[%c3_74, %c0_75, %c0_76] : memref<4x16x32xbf16, #tpu.memory_space<vmem>>, vector<1x16x32xbf16>
    %114 = vector.shape_cast %113 : vector<1x16x32xbf16> to vector<16x32xbf16>
    %cst_77 = arith.constant dense<0.000000e+00> : vector<16x16xf32>
    %115 = tpu.matmul %112, %114, %cst_77 {dimension_numbers = #tpu.dot_dimension_numbers<[1], [1], [0], [0], [0, 0, 1, 0], [], []>} : vector<16x32xbf16>, vector<16x32xbf16>, vector<16x16xf32> -> vector<16x16xf32>
    %cst_78 = arith.constant dense<0xFF800000> : vector<16xf32>
    %116 = vector.multi_reduction <maximumf>, %115, %cst_78 [1] : vector<16x16xf32> to vector<16xf32>
    %117 = vector.shape_cast %116 : vector<16xf32> to vector<16x1xf32>
    %118 = vector.broadcast %117 : vector<16x1xf32> to vector<16x16xf32>
    %119 = arith.subf %115, %118 : vector<16x16xf32>
    %120 = math.exp %119 : vector<16x16xf32>
    %cst_79 = arith.constant dense<0.000000e+00> : vector<16xf32>
    %121 = vector.multi_reduction <add>, %120, %cst_79 [1] : vector<16x16xf32> to vector<16xf32>
    %122 = vector.shape_cast %121 : vector<16xf32> to vector<16x1xf32>
    %123 = arith.truncf %120 : vector<16x16xf32> to vector<16x16xbf16>
    %c3_80 = arith.constant 3 : index
    %c0_81 = arith.constant 0 : index
    %c0_82 = arith.constant 0 : index
    %124 = vector.load %arg22[%c3_80, %c0_81, %c0_82] : memref<4x16x32xbf16, #tpu.memory_space<vmem>>, vector<1x16x32xbf16>
    %125 = vector.shape_cast %124 : vector<1x16x32xbf16> to vector<16x32xbf16>
    %cst_83 = arith.constant dense<0.000000e+00> : vector<16x32xf32>
    %126 = tpu.matmul %123, %125, %cst_83 {dimension_numbers = #tpu.dot_dimension_numbers<[1], [0], [0], [1], [0, 0, 1, 1], [], []>} : vector<16x16xbf16>, vector<16x32xbf16>, vector<16x32xf32> -> vector<16x32xf32>
    %127 = tpu.reciprocal %122 {approx = true} : vector<16x1xf32> -> vector<16x1xf32>
    %128 = vector.broadcast %127 : vector<16x1xf32> to vector<16x32xf32>
    %129 = arith.mulf %126, %128 : vector<16x32xf32>
    %130 = arith.truncf %129 : vector<16x32xf32> to vector<16x32xbf16>
    %c3_84 = arith.constant 3 : index
    %c0_85 = arith.constant 0 : index
    %c0_86 = arith.constant 0 : index
    %131 = vector.load %arg7[%c3_84, %c0_85, %c0_86] : memref<4x32x128xbf16, #tpu.memory_space<vmem>>, vector<1x32x128xbf16>
    %132 = vector.shape_cast %131 : vector<1x32x128xbf16> to vector<32x128xbf16>
    %cst_87 = arith.constant dense<0.000000e+00> : vector<16x128xf32>
    %133 = tpu.matmul %130, %132, %cst_87 {dimension_numbers = #tpu.dot_dimension_numbers<[1], [0], [0], [1], [0, 0, 1, 1], [], []>} : vector<16x32xbf16>, vector<32x128xbf16>, vector<16x128xf32> -> vector<16x128xf32>
    %134 = arith.addf %102, %133 : vector<16x128xf32>
    %c0_88 = arith.constant 0 : index
    %c0_89 = arith.constant 0 : index
    %135 = vector.load %arg11[%c0_88, %c0_89] : memref<1x128xf32, #tpu.memory_space<vmem>>, vector<1x128xf32>
    %136 = vector.broadcast %135 : vector<1x128xf32> to vector<16x128xf32>
    %137 = arith.addf %134, %136 : vector<16x128xf32>
    %138 = arith.addf %137, %4 : vector<16x128xf32>
    %c0_90 = arith.constant 0 : index
    %c0_91 = arith.constant 0 : index
    %139 = vector.load %arg12[%c0_90, %c0_91] : memref<1x128xf32, #tpu.memory_space<vmem>>, vector<1x128xf32>
    %c0_92 = arith.constant 0 : index
    %c0_93 = arith.constant 0 : index
    %140 = vector.load %arg13[%c0_92, %c0_93] : memref<1x128xf32, #tpu.memory_space<vmem>>, vector<1x128xf32>
    %cst_94 = arith.constant dense<0.000000e+00> : vector<16xf32>
    %141 = vector.multi_reduction <add>, %138, %cst_94 [1] : vector<16x128xf32> to vector<16xf32>
    %142 = vector.shape_cast %141 : vector<16xf32> to vector<16x1xf32>
    %cst_95 = arith.constant 1.280000e+02 : f32
    %143 = vector.broadcast %cst_95 : f32 to vector<16x1xf32>
    %144 = arith.divf %142, %143 : vector<16x1xf32>
    %145 = vector.broadcast %144 : vector<16x1xf32> to vector<16x128xf32>
    %146 = arith.subf %138, %145 : vector<16x128xf32>
    %147 = arith.mulf %146, %146 : vector<16x128xf32>
    %cst_96 = arith.constant dense<0.000000e+00> : vector<16xf32>
    %148 = vector.multi_reduction <add>, %147, %cst_96 [1] : vector<16x128xf32> to vector<16xf32>
    %149 = vector.shape_cast %148 : vector<16xf32> to vector<16x1xf32>
    %cst_97 = arith.constant 1.280000e+02 : f32
    %150 = vector.broadcast %cst_97 : f32 to vector<16x1xf32>
    %151 = arith.divf %149, %150 : vector<16x1xf32>
    %152 = vector.broadcast %144 : vector<16x1xf32> to vector<16x128xf32>
    %153 = arith.subf %138, %152 : vector<16x128xf32>
    %cst_98 = arith.constant 9.99999974E-6 : f32
    %154 = vector.broadcast %cst_98 : f32 to vector<16x1xf32>
    %155 = arith.addf %151, %154 : vector<16x1xf32>
    %156 = math.rsqrt %155 : vector<16x1xf32>
    %157 = vector.broadcast %156 : vector<16x1xf32> to vector<16x128xf32>
    %158 = arith.mulf %153, %157 : vector<16x128xf32>
    %159 = vector.broadcast %139 : vector<1x128xf32> to vector<16x128xf32>
    %160 = arith.mulf %158, %159 : vector<16x128xf32>
    %161 = vector.broadcast %140 : vector<1x128xf32> to vector<16x128xf32>
    %162 = arith.addf %160, %161 : vector<16x128xf32>
    %163 = arith.truncf %162 : vector<16x128xf32> to vector<16x128xbf16>
    %c0_99 = arith.constant 0 : index
    %c0_100 = arith.constant 0 : index
    %164 = vector.load %arg14[%c0_99, %c0_100] : memref<128x256xbf16, #tpu.memory_space<vmem>>, vector<128x256xbf16>
    %cst_101 = arith.constant dense<0.000000e+00> : vector<16x256xf32>
    %165 = tpu.matmul %163, %164, %cst_101 {dimension_numbers = #tpu.dot_dimension_numbers<[1], [0], [0], [1], [0, 0, 1, 1], [], []>} : vector<16x128xbf16>, vector<128x256xbf16>, vector<16x256xf32> -> vector<16x256xf32>
    %c0_102 = arith.constant 0 : index
    %c0_103 = arith.constant 0 : index
    %166 = vector.load %arg15[%c0_102, %c0_103] : memref<1x256xf32, #tpu.memory_space<vmem>>, vector<1x256xf32>
    %167 = vector.broadcast %166 : vector<1x256xf32> to vector<16x256xf32>
    %168 = arith.addf %165, %167 : vector<16x256xf32>
    %cst_104 = arith.constant 0.000000e+00 : f32
    %169 = vector.broadcast %cst_104 : f32 to vector<16x256xf32>
    %170 = arith.maximumf %168, %169 : vector<16x256xf32>
    %171 = arith.truncf %170 : vector<16x256xf32> to vector<16x256xbf16>
    %c0_105 = arith.constant 0 : index
    %c0_106 = arith.constant 0 : index
    %172 = vector.load %arg16[%c0_105, %c0_106] : memref<256x128xbf16, #tpu.memory_space<vmem>>, vector<256x128xbf16>
    %cst_107 = arith.constant dense<0.000000e+00> : vector<16x128xf32>
    %173 = tpu.matmul %171, %172, %cst_107 {dimension_numbers = #tpu.dot_dimension_numbers<[1], [0], [0], [1], [0, 0, 1, 1], [], []>} : vector<16x256xbf16>, vector<256x128xbf16>, vector<16x128xf32> -> vector<16x128xf32>
    %c0_108 = arith.constant 0 : index
    %c0_109 = arith.constant 0 : index
    %174 = vector.load %arg17[%c0_108, %c0_109] : memref<1x128xf32, #tpu.memory_space<vmem>>, vector<1x128xf32>
    %175 = vector.broadcast %174 : vector<1x128xf32> to vector<16x128xf32>
    %176 = arith.addf %173, %175 : vector<16x128xf32>
    %177 = arith.addf %176, %162 : vector<16x128xf32>
    %c0_110 = arith.constant 0 : index
    %c0_111 = arith.constant 0 : index
    %178 = vector.load %arg18[%c0_110, %c0_111] : memref<1x128xf32, #tpu.memory_space<vmem>>, vector<1x128xf32>
    %c0_112 = arith.constant 0 : index
    %c0_113 = arith.constant 0 : index
    %179 = vector.load %arg19[%c0_112, %c0_113] : memref<1x128xf32, #tpu.memory_space<vmem>>, vector<1x128xf32>
    %cst_114 = arith.constant dense<0.000000e+00> : vector<16xf32>
    %180 = vector.multi_reduction <add>, %177, %cst_114 [1] : vector<16x128xf32> to vector<16xf32>
    %181 = vector.shape_cast %180 : vector<16xf32> to vector<16x1xf32>
    %cst_115 = arith.constant 1.280000e+02 : f32
    %182 = vector.broadcast %cst_115 : f32 to vector<16x1xf32>
    %183 = arith.divf %181, %182 : vector<16x1xf32>
    %184 = vector.broadcast %183 : vector<16x1xf32> to vector<16x128xf32>
    %185 = arith.subf %177, %184 : vector<16x128xf32>
    %186 = arith.mulf %185, %185 : vector<16x128xf32>
    %cst_116 = arith.constant dense<0.000000e+00> : vector<16xf32>
    %187 = vector.multi_reduction <add>, %186, %cst_116 [1] : vector<16x128xf32> to vector<16xf32>
    %188 = vector.shape_cast %187 : vector<16xf32> to vector<16x1xf32>
    %cst_117 = arith.constant 1.280000e+02 : f32
    %189 = vector.broadcast %cst_117 : f32 to vector<16x1xf32>
    %190 = arith.divf %188, %189 : vector<16x1xf32>
    %191 = vector.broadcast %183 : vector<16x1xf32> to vector<16x128xf32>
    %192 = arith.subf %177, %191 : vector<16x128xf32>
    %cst_118 = arith.constant 9.99999974E-6 : f32
    %193 = vector.broadcast %cst_118 : f32 to vector<16x1xf32>
    %194 = arith.addf %190, %193 : vector<16x1xf32>
    %195 = math.rsqrt %194 : vector<16x1xf32>
    %196 = vector.broadcast %195 : vector<16x1xf32> to vector<16x128xf32>
    %197 = arith.mulf %192, %196 : vector<16x128xf32>
    %198 = vector.broadcast %178 : vector<1x128xf32> to vector<16x128xf32>
    %199 = arith.mulf %197, %198 : vector<16x128xf32>
    %200 = vector.broadcast %179 : vector<1x128xf32> to vector<16x128xf32>
    %201 = arith.addf %199, %200 : vector<16x128xf32>
    %c0_119 = arith.constant 0 : index
    %c0_120 = arith.constant 0 : index
    %c0_121 = arith.constant 0 : index
    %202 = vector.load %arg20[%c0_119, %c0_120, %c0_121] : memref<1x16x128xf32, #tpu.memory_space<vmem>>, vector<1x16x128xf32>
    %203 = vector.shape_cast %202 : vector<1x16x128xf32> to vector<16x128xf32>
    %204 = vector.shape_cast %201 : vector<16x128xf32> to vector<1x16x128xf32>
    tpu.vector_store %arg20[%c0_119, %c0_120, %c0_121], %204 {strides = array<i32>} : memref<1x16x128xf32, #tpu.memory_space<vmem>>, vector<1x16x128xf32>,
    return
  }
  func.func @transform_0(%arg0: i32, %arg1: i32) -> (i32, i32, i32) {
    %c0_i32 = arith.constant 0 : i32
    %c0_i32_0 = arith.constant 0 : i32
    return %arg0, %arg1, %c0_i32 : i32, i32, i32
  }
  func.func @transform_1(%arg0: i32, %arg1: i32) -> (i32, i32, i32) {
    %c0_i32 = arith.constant 0 : i32
    %c0_i32_0 = arith.constant 0 : i32
    %c0_i32_1 = arith.constant 0 : i32
    return %arg0, %c0_i32, %c0_i32_0 : i32, i32, i32
  }
  func.func @transform_2(%arg0: i32, %arg1: i32) -> (i32, i32, i32) {
    %c0_i32 = arith.constant 0 : i32
    %c0_i32_0 = arith.constant 0 : i32
    %c0_i32_1 = arith.constant 0 : i32
    %c0_i32_2 = arith.constant 0 : i32
    return %c0_i32, %c0_i32_0, %c0_i32_1 : i32, i32, i32
  }
  func.func @transform_3(%arg0: i32, %arg1: i32) -> (i32, i32, i32) {
    %c0_i32 = arith.constant 0 : i32
    %c0_i32_0 = arith.constant 0 : i32
    %c0_i32_1 = arith.constant 0 : i32
    %c0_i32_2 = arith.constant 0 : i32
    return %c0_i32, %c0_i32_0, %c0_i32_1 : i32, i32, i32
  }
  func.func @transform_4(%arg0: i32, %arg1: i32) -> (i32, i32, i32) {
    %c0_i32 = arith.constant 0 : i32
    %c0_i32_0 = arith.constant 0 : i32
    %c0_i32_1 = arith.constant 0 : i32
    %c0_i32_2 = arith.constant 0 : i32
    return %c0_i32, %c0_i32_0, %c0_i32_1 : i32, i32, i32
  }
  func.func @transform_5(%arg0: i32, %arg1: i32) -> (i32, i32, i32) {
    %c0_i32 = arith.constant 0 : i32
    %c0_i32_0 = arith.constant 0 : i32
    %c0_i32_1 = arith.constant 0 : i32
    %c0_i32_2 = arith.constant 0 : i32
    return %c0_i32, %c0_i32_0, %c0_i32_1 : i32, i32, i32
  }
  func.func @transform_6(%arg0: i32, %arg1: i32) -> (i32, i32, i32) {
    %c0_i32 = arith.constant 0 : i32
    %c0_i32_0 = arith.constant 0 : i32
    %c0_i32_1 = arith.constant 0 : i32
    %c0_i32_2 = arith.constant 0 : i32
    return %c0_i32, %c0_i32_0, %c0_i32_1 : i32, i32, i32
  }
  func.func @transform_7(%arg0: i32, %arg1: i32) -> (i32, i32, i32) {
    %c0_i32 = arith.constant 0 : i32
    %c0_i32_0 = arith.constant 0 : i32
    %c0_i32_1 = arith.constant 0 : i32
    %c0_i32_2 = arith.constant 0 : i32
    return %c0_i32, %c0_i32_0, %c0_i32_1 : i32, i32, i32
  }
  func.func @transform_8(%arg0: i32, %arg1: i32) -> (i32, i32, i32) {
    %c0_i32 = arith.constant 0 : i32
    %c0_i32_0 = arith.constant 0 : i32
    %c0_i32_1 = arith.constant 0 : i32
    %c0_i32_2 = arith.constant 0 : i32
    return %c0_i32, %c0_i32_0, %c0_i32_1 : i32, i32, i32
  }
  func.func @transform_9(%arg0: i32, %arg1: i32) -> (i32, i32) {
    %c0_i32 = arith.constant 0 : i32
    %c0_i32_0 = arith.constant 0 : i32
    %c0_i32_1 = arith.constant 0 : i32
    return %c0_i32, %c0_i32_0 : i32, i32
  }
  func.func @transform_10(%arg0: i32, %arg1: i32) -> (i32, i32) {
    %c0_i32 = arith.constant 0 : i32
    %c0_i32_0 = arith.constant 0 : i32
    %c0_i32_1 = arith.constant 0 : i32
    return %c0_i32, %c0_i32_0 : i32, i32
  }
  func.func @transform_11(%arg0: i32, %arg1: i32) -> (i32, i32) {
    %c0_i32 = arith.constant 0 : i32
    %c0_i32_0 = arith.constant 0 : i32
    %c0_i32_1 = arith.constant 0 : i32
    return %c0_i32, %c0_i32_0 : i32, i32
  }
  func.func @transform_12(%arg0: i32, %arg1: i32) -> (i32, i32) {
    %c0_i32 = arith.constant 0 : i32
    %c0_i32_0 = arith.constant 0 : i32
    %c0_i32_1 = arith.constant 0 : i32
    return %c0_i32, %c0_i32_0 : i32, i32
  }
  func.func @transform_13(%arg0: i32, %arg1: i32) -> (i32, i32) {
    %c0_i32 = arith.constant 0 : i32
    %c0_i32_0 = arith.constant 0 : i32
    %c0_i32_1 = arith.constant 0 : i32
    return %c0_i32, %c0_i32_0 : i32, i32
  }
  func.func @transform_14(%arg0: i32, %arg1: i32) -> (i32, i32) {
    %c0_i32 = arith.constant 0 : i32
    %c0_i32_0 = arith.constant 0 : i32
    %c0_i32_1 = arith.constant 0 : i32
    return %c0_i32, %c0_i32_0 : i32, i32
  }
  func.func @transform_15(%arg0: i32, %arg1: i32) -> (i32, i32) {
    %c0_i32 = arith.constant 0 : i32
    %c0_i32_0 = arith.constant 0 : i32
    %c0_i32_1 = arith.constant 0 : i32
    return %c0_i32, %c0_i32_0 : i32, i32
  }
  func.func @transform_16(%arg0: i32, %arg1: i32) -> (i32, i32) {
    %c0_i32 = arith.constant 0 : i32
    %c0_i32_0 = arith.constant 0 : i32
    %c0_i32_1 = arith.constant 0 : i32
    return %c0_i32, %c0_i32_0 : i32, i32
  }
  func.func @transform_17(%arg0: i32, %arg1: i32) -> (i32, i32) {
    %c0_i32 = arith.constant 0 : i32
    %c0_i32_0 = arith.constant 0 : i32
    %c0_i32_1 = arith.constant 0 : i32
    return %c0_i32, %c0_i32_0 : i32, i32
  }
  func.func @transform_18(%arg0: i32, %arg1: i32) -> (i32, i32, i32) {
    %c0_i32 = arith.constant 0 : i32
    %c0_i32_0 = arith.constant 0 : i32
    return %arg0, %arg1, %c0_i32 : i32, i32, i32
  }
}

</mosaic_0001>

<bundles_post_ra>
// kernel: tpu_custom_call.1
= control target key start
LH: loop header
LB: loop body
LE: loop exit
PB: predicated region body
PF: predicated region fallthrough
CT: control target
= control target key end

     0   :  { %s5564_s0 = inlined_call_operand.vmem [shape: f32[2,16,128], index: 0, kind: input, shape index: {}]   ;;  %s5565_s1 = inlined_call_operand.vmem [shape: f32[2,16,128], index: 1, kind: input, shape index: {}]   ;;  %s5566_s2 = inlined_call_operand.vmem [shape: bf16[4,128,32], index: 2, kind: input, shape index: {}]   ;;  %s5567_s3 = inlined_call_operand.vmem [shape: bf16[4,128,32], index: 3, kind: input, shape index: {}]   ;;  %s5568_s4 = inlined_call_operand.vmem [shape: bf16[4,128,32], index: 4, kind: input, shape index: {}]   ;;  %s5569_s5 = inlined_call_operand.vmem [shape: bf16[4,32,128], index: 5, kind: input, shape index: {}]   ;;  %s5570_s6 = inlined_call_operand.vmem [shape: f32[4,1,32], index: 6, kind: input, shape index: {}]   ;;  %s5571_s7 = inlined_call_operand.vmem [shape: f32[4,1,32], index: 7, kind: input, shape index: {}]   ;;  %s5572_s8 = inlined_call_operand.vmem [shape: f32[4,1,32], index: 8, kind: input, shape index: {}]   ;;  %s5573_s9 = inlined_call_operand.vmem [shape: f32[1,128], index: 9, kind: input, shape index: {}]   ;;  %s5574_s10 = inlined_call_operand.vmem [shape: f32[1,128], index: 10, kind: input, shape index: {}]   ;;  %s5575_s11 = inlined_call_operand.vmem [shape: f32[1,128], index: 11, kind: input, shape index: {}]   ;;  %s5576_s12 = inlined_call_operand.vmem [shape: bf16[128,256], index: 12, kind: input, shape index: {}]   ;;  %s5577_s13 = inlined_call_operand.vmem [shape: f32[1,256], index: 13, kind: input, shape index: {}]   ;;  %s5578_s14 = inlined_call_operand.vmem [shape: bf16[256,128], index: 14, kind: input, shape index: {}]   ;;  %s5579_s15 = inlined_call_operand.vmem [shape: f32[1,128], index: 15, kind: input, shape index: {}]   ;;  %s5580_s16 = inlined_call_operand.vmem [shape: f32[1,128], index: 16, kind: input, shape index: {}]   ;;  %s5581_s17 = inlined_call_operand.vmem [shape: f32[1,128], index: 17, kind: input, shape index: {}]   ;;  %s5582_s18 = inlined_call_operand.hbm [shape: f32[2,16,128], index: 18, kind: output, shape index: {}]  }
   0x1   :  { %5591 = sst [smem:[#allocation14_spill]] %s5564_s0 }
   0x2   :  { %5592 = sst [smem:[#allocation15_spill]] %s5565_s1 }
   0x3   :  { %5593 = sst [smem:[#allocation16_spill]] %s5566_s2 }
   0x4   :  { %5594 = sst [smem:[#allocation17_spill]] %s5567_s3 }
   0x5   :  { %23 = vsyncpa [#allocation5], 0 }
   0x6   :  { %25 = vsyncpa [#allocation5 + $0x1], 0  ;;  %s4707_s27 = smov 0   ;;  %s4709_s28 = smov 0  }
   0x7   :  { %s4711_s29 = smov 0   ;;  %s4713_s30 = smov 0  }
   0x8   :  { %s4715_s0 = smov 0   ;;  %s4717_s19 = smov 0  }
   0x9 LB: > { %5595 = sst [smem:[#allocation7_spill]] %s4584_s27  ;;  %s3409_s1 = sadd.s32 4294967295, %s4604_s19   ;;  %s4604_s19 = sphi %s4717_s19, %s31_s19   ;;  %s4600_s0 = sphi %s4715_s0, %s5617_s0   ;;  %s4596_s30 = sphi %s4713_s30, %s5613_s30   ;;  %s4592_s29 = sphi %s4711_s29, %s5612_s29   ;;  %s4588_s28 = sphi %s4709_s28, %s5616_s28   ;;  %s4584_s27 = sphi %s4707_s27, %s5615_s27  }
   0xa   : > { %5596 = sst [smem:[#allocation8_spill]] %s4592_s29  ;;  %s3410_s20 = sadd.s32 4294967294, %s4604_s19  }
   0xb   : > { %5597 = sst [smem:[#allocation9_spill]] %s4600_s0  ;;  %s43_s21 = sadd.s32 1, %s4600_s0 }
   0xc   : > { %5598 = sst [smem:[#allocation10_spill]] %s4604_s19  ;;  %s442_s22 = sadd.s32 1, %s4592_s29 }
   0xd   : > { %p45_p0 = scmp.ge.s32.totalorder %s43_s21, 2  ;;  %p452_p1 = scmp.ne.s32.totalorder %s4592_s29, %s4588_s28 }
   0xe   : > { %p453_p2 = scmp.eq.s32.totalorder %s3409_s1, 1  ;;  %p458_p3 = scmp.ne.s32.totalorder %s4588_s28, %s4584_s27 }
   0xf   : > { %s5619_s21 = smov (%p45_p0, %s43_s21), 0  ;;  %p459_p5 = scmp.eq.s32.totalorder %s3410_s20, 1 }
  0x10   : > { %5599 = sst [smem:[#allocation11_spill]] %s5619_s21  ;;  %p4747_p4 = por %p453_p2, %p452_p1 }
  0x11   : > { %s437_s23 = ssub.s32 %s4600_s0, %s5619_s21  ;;  %p3413_p6 = scmp.ge.s32.totalorder %s4604_s19, 1 }
  0x12   : > { %p440_p7 = scmp.eq.s32.totalorder %s437_s23, 0  ;;  %p4754_p8 = por %p459_p5, %p458_p3 }
  0x13   : > { %p546_p9 = scmp.lt.s32.totalorder %s4604_s19, 3 }
  0x14   : > { %s5601_s24 = scalar_select %p4754_p8, 1, 0 }
  0x15   : > { %s4760_s25 = scalar_select %p440_p7, %s4592_s29, %s442_s22  }
  0x16   : > { %5602 = sst [smem:[#allocation12_spill]] %s5601_s24  ;;  %p547_p10 = pnand %p3413_p6, %p546_p9 }
  0x17   : > { %5603 = sst [smem:[#allocation13_spill]] %s4760_s25  ;;  %p610_p11 = scmp.lt.s32.totalorder (!%p547_p10), %s4596_s30, 1 }
  0x18   : > { %550 = sbr.rel (%p547_p10) target bundleno = 4367 (0x110f), region = 92  ;;  %s5604_s3 = sld [smem:[#allocation17_spill]] (!%p547_p10) }
  0x19   : > { %s5605_s29 = sld [smem:[#allocation15_spill]] (!%p547_p10)  ;;  %s606_s21 = sand.u32 (!%p547_p10), 1, %s4588_s28  }
  0x1a   : > { %s5606_s25 = sld [smem:[#allocation16_spill]] (!%p547_p10)  ;;  %s3414_s26 = sshll.u32 (!%p547_p10), %s606_s21, 4 }
  0x1b   : > { %s5607_s23 = sld [smem:[#allocation14_spill]] (!%p547_p10) }
  0x1d   : > { %v4606_v1 = vmov 0.0   ;;  %vm4607_vm0 = vmmov 0   ;;  %s4789_s0 = scalar_select %p610_p11, %s4596_s30, 1  ;;  %v4365_v13 = vld [vmem:[%s5568_s4 + $0x38] sm:$0xff]   ;;  %v4367_v14 = vld [vmem:[%s5568_s4 + $0x30] sm:$0xff]   ;;  %v4369_v16 = vld [vmem:[%s5568_s4 + $0x28] sm:$0xff]  }
  0x1e   : > { %v4336_v0 = vld [vmem:[%s5604_s3 + $0x38] sm:$0xff]   ;;  %3956 = vmatprep.subr.bf16.mxu0 %v4606_v1  ;;  %3976 = vmatprep.subr.bf16.mxu1 %v4606_v1  ;;  %v4337_v2 = vld [vmem:[%s5604_s3 + $0x30] sm:$0xff]   ;;  %v4338_v3 = vld [vmem:[%s5604_s3 + $0x28] sm:$0xff]   ;;  %vm865_vm1 = vcmask 257024   ;;  %vm1753_vm2 = vcmask 261120   ;;  %vm1801_vm3 = vcmask 130048  }
  0x1f   : > { %3957 = vmatpush3.bf16.msra.mxu0 %v4336_v0  ;;  %3972 = vmatprep.mubr.msk.bf16.mxu0 %vm4607_vm0, %v4606_v1  ;;  %v4339_v4 = vld [vmem:[%s5604_s3 + $0x20] sm:$0xff]   ;;  %v4340_v5 = vld [vmem:[%s5604_s3 + $0x18] sm:$0xff]   ;;  %v4341_v6 = vld [vmem:[%s5604_s3 + $0x10] sm:$0xff]   ;;  %s3779_s1 = sshll.u32 %s4789_s0, 4  ;;  %s608_s0 = scalar_lea.vmem [#allocation4], %s3414_s26 }
  0x20   : > { %3958 = vmatprep.subr.bf16.mxu0 %v4606_v1  ;;  %3992 = vmatprep.mubr.msk.bf16.mxu1 %vm4607_vm0, %v4606_v1  ;;  %v4342_v7 = vld [vmem:[%s5604_s3 + $0x8] sm:$0xff]   ;;  %s623_s24 = scalar_lea.vmem %s5605_s29, %s3779_s1  ;;  %v4343_v8 = vld [vmem:[%s5604_s3] sm:$0xff]   ;;  %v4344_v12 = vld [vmem:[%s5604_s3 + $0x78] sm:$0xff]  }
  0x21   : > { %v630_v9 = vld [vmem:[%s623_s24] sm:$0xff]  ;;  %v631_v10 = vld [vmem:[%s623_s24 + $0x8] sm:$0xff]  ;;  %3977 = vmatpush3.bf16.msra.mxu1 %v4365_v13  ;;  %v4345_v15 = vld [vmem:[%s5604_s3 + $0x70] sm:$0xff]   ;;  %s617_s22 = scalar_lea.vmem %s5607_s23, %s3779_s1  ;;  %s3318_s1 = sshll.u32 %s608_s0, 4  ;;  %s5517_s1 = int_to_ptr.vmem [resolvable:$true] %s3318_s1 }
  0x22   : > { %v4809_v11 = vpack.c.bf16 %v631_v10, %v630_v9  ;;  %3978 = vmatprep.subr.bf16.mxu1 %v4606_v1  ;;  %v4346_v17 = vld [vmem:[%s5604_s3 + $0x68] sm:$0xff]   ;;  %v4371_v18 = vld [vmem:[%s5568_s4 + $0x20] sm:$0xff]   ;;  %v4373_v20 = vld [vmem:[%s5568_s4 + $0x18] sm:$0xff]   ;;  %s5519_s23 = scalar_lea.sflag [#allocation5], %s606_s21 }
  0x23   : > { %3959 = vmatpush3.bf16.msra.mxu0 %v4337_v2  ;;  %v4347_v19 = vld [vmem:[%s5604_s3 + $0x60] sm:$0xff]   ;;  %v4348_v21 = vld [vmem:[%s5604_s3 + $0x58] sm:$0xff]   ;;  %v4375_v22 = vld [vmem:[%s5568_s4 + $0x10] sm:$0xff]  }
  0x24   : > { %3960 = vmatprep.subr.bf16.mxu0 %v4606_v1  ;;  %v4349_v23 = vld [vmem:[%s5604_s3 + $0x50] sm:$0xff]   ;;  %v4377_v24 = vld [vmem:[%s5568_s4 + $0x8] sm:$0xff]   ;;  %v4379_v26 = vld [vmem:[%s5568_s4] sm:$0xff]  }
  0x25   : > { %3979 = vmatpush3.bf16.msra.mxu1 %v4367_v14  ;;  %v4350_v25 = vld [vmem:[%s5604_s3 + $0x48] sm:$0xff]   ;;  %v4351_v27 = vld [vmem:[%s5604_s3 + $0x40] sm:$0xff]   ;;  %v4381_v28 = vld [vmem:[%s5568_s4 + $0x78] sm:$0xff]  }
  0x26   : > { %3980 = vmatprep.subr.bf16.mxu1 %v4606_v1  ;;  %v4352_v29 = vld [vmem:[%s5604_s3 + $0xb8] sm:$0xff]   ;;  %v4383_v30 = vld [vmem:[%s5568_s4 + $0x70] sm:$0xff]   ;;  %v4354_v32 = vld [vmem:[%s5604_s3 + $0xa8] sm:$0xff]  }
  0x27   : > { %3961 = vmatpush3.bf16.msra.mxu0 %v4338_v3  ;;  %v4353_v31 = vld [vmem:[%s5604_s3 + $0xb0] sm:$0xff]   ;;  %v4385_v33 = vld [vmem:[%s5568_s4 + $0x68] sm:$0xff]   ;;  %v4387_v34 = vld [vmem:[%s5568_s4 + $0x60] sm:$0xff]  }
  0x28   : > { %3962 = vmatprep.subr.bf16.mxu0 %v4606_v1  ;;  %v4355_v35 = vld [vmem:[%s5604_s3 + $0xa0] sm:$0xff]   ;;  %v4388_v36 = vld [vmem:[%s5568_s4 + $0x58] sm:$0xff]   ;;  %v4389_v38 = vld [vmem:[%s5568_s4 + $0x50] sm:$0xff]  }
  0x29   : > { %3981 = vmatpush3.bf16.msra.mxu1 %v4369_v16  ;;  %v4356_v37 = vld [vmem:[%s5604_s3 + $0x98] sm:$0xff]   ;;  %v4357_v39 = vld [vmem:[%s5604_s3 + $0x90] sm:$0xff]   ;;  %v4390_v40 = vld [vmem:[%s5568_s4 + $0x48] sm:$0xff]  }
  0x2a   : > { %3982 = vmatprep.subr.bf16.mxu1 %v4606_v1  ;;  %v4358_v41 = vld [vmem:[%s5604_s3 + $0x88] sm:$0xff]   ;;  %v4391_v42 = vld [vmem:[%s5568_s4 + $0x40] sm:$0xff]   ;;  %v4392_v44 = vld [vmem:[%s5568_s4 + $0xb8] sm:$0xff]  }
  0x2b   : > { %3963 = vmatpush3.bf16.msra.mxu0 %v4339_v4  ;;  %v4359_v43 = vld [vmem:[%s5604_s3 + $0x80] sm:$0xff]   ;;  %v4360_v45 = vld [vmem:[%s5604_s3 + $0xf8] sm:$0xff]   ;;  %v4393_v46 = vld [vmem:[%s5568_s4 + $0xb0] sm:$0xff]  }
  0x2c   : > { %3964 = vmatprep.subr.bf16.mxu0 %v4606_v1  ;;  %v4361_v47 = vld [vmem:[%s5604_s3 + $0xf0] sm:$0xff]   ;;  %v4362_v48 = vld [vmem:[%s5604_s3 + $0xe8] sm:$0xff]   ;;  %v4395_v50 = vld [vmem:[%s5568_s4 + $0xa0] sm:$0xff]  }
  0x2d   : > { %3983 = vmatpush3.bf16.msra.mxu1 %v4371_v18  ;;  %v4394_v49 = vld [vmem:[%s5568_s4 + $0xa8] sm:$0xff]   ;;  %v4363_v51 = vld [vmem:[%s5604_s3 + $0xe0] sm:$0xff]   ;;  %v4396_v52 = vld [vmem:[%s5568_s4 + $0x98] sm:$0xff]  }
  0x2e   : > { %3984 = vmatprep.subr.bf16.mxu1 %v4606_v1  ;;  %v4364_v53 = vld [vmem:[%s5604_s3 + $0xd8] sm:$0xff]   ;;  %v4397_v54 = vld [vmem:[%s5568_s4 + $0x90] sm:$0xff]   ;;  %v4398_v56 = vld [vmem:[%s5568_s4 + $0x88] sm:$0xff]  }
  0x2f   : > { %3965 = vmatpush3.bf16.msra.mxu0 %v4340_v5  ;;  %v4366_v55 = vld [vmem:[%s5604_s3 + $0xd0] sm:$0xff]   ;;  %v4368_v57 = vld [vmem:[%s5604_s3 + $0xc8] sm:$0xff]   ;;  %v4399_v58 = vld [vmem:[%s5568_s4 + $0x80] sm:$0xff]  }
  0x30   : > { %3966 = vmatprep.subr.bf16.mxu0 %v4606_v1  ;;  %v4370_v59 = vld [vmem:[%s5604_s3 + $0xc0] sm:$0xff]   ;;  %v4400_v60 = vld [vmem:[%s5568_s4 + $0xf8] sm:$0xff]   ;;  %v4401_v62 = vld [vmem:[%s5568_s4 + $0xf0] sm:$0xff]   ;;  %s3797_s3 = sshll.u32 %s4596_s30, 8  ;;  %s4609_s30 = smov [#allocation4]  }
  0x31   : > { %3985 = vmatpush3.bf16.msra.mxu1 %v4373_v20  ;;  %v4372_v61 = vld [vmem:[%s5606_s25 + $0x38] sm:$0xff]   ;;  %v4374_v63 = vld [vmem:[%s5606_s25 + $0x30] sm:$0xff]   ;;  %v4402_v0 = vld [vmem:[%s5568_s4 + $0xe8] sm:$0xff]   ;;  %s5515_s20 = scalar_lea.hbm %s5582_s18, %s3797_s3  ;;  %s4532_s26 = sshll.u32 %s4609_s30, 4  ;;  %s4533_s26 = int_to_ptr.vmem [resolvable:$false] %s4532_s26 }
  0x32   : > { %3986 = vmatprep.subr.bf16.mxu1 %v4606_v1  ;;  %v4376_v2 = vld [vmem:[%s5606_s25 + $0x28] sm:$0xff]   ;;  %v4403_v3 = vld [vmem:[%s5568_s4 + $0xe0] sm:$0xff]   ;;  %v4404_v5 = vld [vmem:[%s5568_s4 + $0xd8] sm:$0xff]   ;;  %s4534_s29 = scalar_lea.vmem %s4533_s26, 512  ;;  %p4535_p1 = scmp.lt.s32.totalorder %s5517_s1, %s4533_s26 }
  0x33   : > { %3967 = vmatpush3.bf16.msra.mxu0 %v4341_v6  ;;  %v4378_v4 = vld [vmem:[%s5606_s25 + $0x20] sm:$0xff]   ;;  %v4380_v6 = vld [vmem:[%s5606_s25 + $0x18] sm:$0xff]   ;;  %v4406_v9 = vld [vmem:[%s5568_s4 + $0xc8] sm:$0xff]  }
  0x34   : > { %3968 = vmatprep.subr.bf16.mxu0 %v4606_v1  ;;  %v4384_v10 = vld [vmem:[%s5606_s25 + $0x8] sm:$0xff]   ;;  %v4386_v13 = vld [vmem:[%s5606_s25] sm:$0xff]  }
  0x35   : > { %3987 = vmatpush3.bf16.msra.mxu1 %v4375_v22  ;;  %v5091_v14 = vld [vmem:[%s617_s22] sm:$0xff] }
  0x36   : > { %3988 = vmatprep.subr.bf16.mxu1 %v4606_v1 }
  0x37   : > { %3969 = vmatpush3.bf16.msra.mxu0 %v4342_v7  ;;  %v4405_v7 = vld [vmem:[%s5568_s4 + $0xd0] sm:$0xff]  }
  0x38   : > { %3970 = vmatprep.subr.bf16.mxu0 %v4606_v1 }
  0x39   : > { %3989 = vmatpush3.bf16.msra.mxu1 %v4377_v24 }
  0x3a   : > { %3990 = vmatprep.subr.bf16.mxu1 %v4606_v1 }
  0x3b   : > { %3971 = vmatpush3.bf16.msra.mxu0 %v4343_v8  ;;  %v4382_v8 = vld [vmem:[%s5606_s25 + $0x10] sm:$0xff]  }
  0x3c   : > { %3996 = vmatprep.subr.bf16.mxu0 %v4606_v1 }
  0x3d   : > { %3991 = vmatpush3.bf16.msra.mxu1 %v4379_v26 }
  0x3e   : > { %3973 = vmatmul.mubr.bf16.vlgmr.msra.gmra.mxu0 %v4809_v11  ;;  %4016 = vmatprep.subr.bf16.mxu1 %v4606_v1 }
  0x3f   : > { %3997 = vmatpush3.bf16.msra.mxu0 %v4344_v12  ;;  %4012 = vmatprep.mubr.msk.bf16.mxu0 %vm4607_vm0, %v4606_v1  ;;  %v4407_v12 = vld [vmem:[%s5568_s4 + $0xc0] sm:$0xff]  }
  0x40   : > { %3998 = vmatprep.subr.bf16.mxu0 %v4606_v1  ;;  %3993 = vmatmul.mubr.bf16.vlgmr.msra.gmra.mxu1 %v4809_v11 }
  0x41   : > { %4017 = vmatpush3.bf16.msra.mxu1 %v4381_v28  ;;  %4032 = vmatprep.mubr.msk.bf16.mxu1 %vm4607_vm0, %v4606_v1  ;;  %v3458_v28 = vld [vmem:[%s5571_s7 + $0x1] ss:$0 sm:$0xff] }
  0x42   : > { %4018 = vmatprep.subr.bf16.mxu1 %v4606_v1 }
  0x43   : > { %3999 = vmatpush3.bf16.msra.mxu0 %v4345_v15  ;;  %v5093_v15 = vld [vmem:[%s617_s22 + $0x8] sm:$0xff]  ;;  %s4528_s22 = scalar_lea.vmem %s5517_s1, 256 }
  0x44   : > { %4000 = vmatprep.subr.bf16.mxu0 %v4606_v1  ;;  %v5098_v16 = vpack.c.bf16 %v5093_v15, %v5091_v14  ;;  %p4529_p12 = scmp.ne.s32.totalorder %s5517_s1, %s4528_s22  ;;  %p4536_p2 = scmp.lt.s32.totalorder %s4534_s29, %s4528_s22 }
  0x45   : > { %4019 = vmatpush3.bf16.msra.mxu1 %v4383_v30 }
  0x46   : > { %4020 = vmatprep.subr.bf16.mxu1 %v4606_v1  ;;  %p4530_p13 = pnand %p4529_p12, %p4747_p4  ;;  %p4537_p3 = por %p4536_p2, %p4535_p1 }
  0x47   : > { %4001 = vmatpush3.bf16.msra.mxu0 %v4346_v17  ;;  %v3419_v17 = vld [vmem:[%s5571_s7] ss:$0 sm:$0xff] }
  0x48   : > { %4002 = vmatprep.subr.bf16.mxu0 %v4606_v1  ;;  %p4531_p0 = pneg %p4530_p13 }
  0x49   : > { %4021 = vmatpush3.bf16.msra.mxu1 %v4385_v33 }
  0x4a   : > { %4022 = vmatprep.subr.bf16.mxu1 %v4606_v1  ;;  %p4538_p5 = pnand %p4537_p3, %p4531_p0 }
  0x4b   : > { %4003 = vmatpush3.bf16.msra.mxu0 %v4347_v19 }
  0x4c   : > { %4004 = vmatprep.subr.bf16.mxu0 %v4606_v1 }
  0x4d   : > { %4023 = vmatpush3.bf16.msra.mxu1 %v4387_v34 }
  0x4e   : > { %4024 = vmatprep.subr.bf16.mxu1 %v4606_v1 }
  0x4f   : > { %4005 = vmatpush3.bf16.msra.mxu0 %v4348_v21 }
  0x50   : > { %4006 = vmatprep.subr.bf16.mxu0 %v4606_v1 }
  0x51   : > { %4025 = vmatpush3.bf16.msra.mxu1 %v4388_v36 }
  0x52   : > { %4026 = vmatprep.subr.bf16.mxu1 %v4606_v1 }
  0x53   : > { %4007 = vmatpush3.bf16.msra.mxu0 %v4349_v23 }
  0x54   : > { %4008 = vmatprep.subr.bf16.mxu0 %v4606_v1 }
  0x55   : > { %4027 = vmatpush3.bf16.msra.mxu1 %v4389_v38 }
  0x56   : > { %4028 = vmatprep.subr.bf16.mxu1 %v4606_v1 }
  0x57   : > { %4009 = vmatpush3.bf16.msra.mxu0 %v4350_v25 }
  0x58   : > { %4010 = vmatprep.subr.bf16.mxu0 %v4606_v1 }
  0x59   : > { %4029 = vmatpush3.bf16.msra.mxu1 %v4390_v40 }
  0x5a   : > { %4030 = vmatprep.subr.bf16.mxu1 %v4606_v1 }
  0x5b   : > { %4011 = vmatpush3.bf16.msra.mxu0 %v4351_v27  ;;  %v3428_v27 = vld [vmem:[%s5572_s8] ss:$0 sm:$0xff] }
  0x5c   : > { %4036 = vmatprep.subr.bf16.mxu0 %v4606_v1 }
  0x5d   : > { %4031 = vmatpush3.bf16.msra.mxu1 %v4391_v42 }
  0x5e   : > { %4013 = vmatmul.mubr.bf16.vlgmr.msra.gmra.mxu0 %v4809_v11  ;;  %4056 = vmatprep.subr.bf16.mxu1 %v4606_v1 }
  0x5f   : > { %4037 = vmatpush3.bf16.msra.mxu0 %v4352_v29  ;;  %4052 = vmatprep.mubr.msk.bf16.mxu0 %vm4607_vm0, %v4606_v1 }
  0x60   : > { %4038 = vmatprep.subr.bf16.mxu0 %v4606_v1  ;;  %4033 = vmatmul.mubr.bf16.vlgmr.msra.gmra.mxu1 %v4809_v11 }
  0x61   : > { %4057 = vmatpush3.bf16.msra.mxu1 %v4392_v44  ;;  %4072 = vmatprep.mubr.msk.bf16.mxu1 %vm4607_vm0, %v4606_v1 }
  0x62   : > { %4058 = vmatprep.subr.bf16.mxu1 %v4606_v1 }
  0x63   : > { %4039 = vmatpush3.bf16.msra.mxu0 %v4353_v31 }
  0x64   : > { %4040 = vmatprep.subr.bf16.mxu0 %v4606_v1 }
  0x65   : > { %4059 = vmatpush3.bf16.msra.mxu1 %v4393_v46 }
  0x66   : > { %4060 = vmatprep.subr.bf16.mxu1 %v4606_v1 }
  0x67   : > { %4041 = vmatpush3.bf16.msra.mxu0 %v4354_v32 }
  0x68   : > { %4042 = vmatprep.subr.bf16.mxu0 %v4606_v1 }
  0x69   : > { %4061 = vmatpush3.bf16.msra.mxu1 %v4394_v49 }
  0x6a   : > { %4062 = vmatprep.subr.bf16.mxu1 %v4606_v1 }
  0x6b   : > { %4043 = vmatpush3.bf16.msra.mxu0 %v4355_v35 }
  0x6c   : > { %4044 = vmatprep.subr.bf16.mxu0 %v4606_v1 }
  0x6d   : > { %4063 = vmatpush3.bf16.msra.mxu1 %v4395_v50 }
  0x6e   : > { %4064 = vmatprep.subr.bf16.mxu1 %v4606_v1 }
  0x6f   : > { %4045 = vmatpush3.bf16.msra.mxu0 %v4356_v37 }
  0x70   : > { %4046 = vmatprep.subr.bf16.mxu0 %v4606_v1 }
  0x71   : > { %4065 = vmatpush3.bf16.msra.mxu1 %v4396_v52 }
  0x72   : > { %4066 = vmatprep.subr.bf16.mxu1 %v4606_v1 }
  0x73   : > { %4047 = vmatpush3.bf16.msra.mxu0 %v4357_v39 }
  0x74   : > { %4048 = vmatprep.subr.bf16.mxu0 %v4606_v1 }
  0x75   : > { %4067 = vmatpush3.bf16.msra.mxu1 %v4397_v54 }
  0x76   : > { %4068 = vmatprep.subr.bf16.mxu1 %v4606_v1 }
  0x77   : > { %4049 = vmatpush3.bf16.msra.mxu0 %v4358_v41 }
  0x78   : > { %4050 = vmatprep.subr.bf16.mxu0 %v4606_v1 }
  0x79   : > { %4069 = vmatpush3.bf16.msra.mxu1 %v4398_v56 }
  0x7a   : > { %4070 = vmatprep.subr.bf16.mxu1 %v4606_v1 }
  0x7b   : > { %4051 = vmatpush3.bf16.msra.mxu0 %v4359_v43 }
  0x7c   : > { %4076 = vmatprep.subr.bf16.mxu0 %v4606_v1 }
  0x7d   : > { %4071 = vmatpush3.bf16.msra.mxu1 %v4399_v58 }
  0x7e   : > { %4053 = vmatmul.mubr.bf16.vlgmr.msra.gmra.mxu0 %v4809_v11  ;;  %4096 = vmatprep.subr.bf16.mxu1 %v4606_v1 }
  0x7f   : > { %4077 = vmatpush3.bf16.msra.mxu0 %v4360_v45  ;;  %4092 = vmatprep.mubr.msk.bf16.mxu0 %vm4607_vm0, %v4606_v1 }
  0x80   : > { %4078 = vmatprep.subr.bf16.mxu0 %v4606_v1  ;;  %4073 = vmatmul.mubr.bf16.vlgmr.msra.gmra.mxu1 %v4809_v11 }
  0x81   : > { %4097 = vmatpush3.bf16.msra.mxu1 %v4400_v60  ;;  %4112 = vmatprep.mubr.msk.bf16.mxu1 %vm4607_vm0, %v4606_v1 }
  0x82   : > { %4098 = vmatprep.subr.bf16.mxu1 %v4606_v1 }
  0x83   : > { %4079 = vmatpush3.bf16.msra.mxu0 %v4361_v47  ;;  %v3484_v47 = vld [vmem:[%s5572_s8 + $0x1] ss:$0 sm:$0xff] }
  0x84   : > { %4080 = vmatprep.subr.bf16.mxu0 %v4606_v1 }
  0x85   : > { %4099 = vmatpush3.bf16.msra.mxu1 %v4401_v62 }
  0x86   : > { %4100 = vmatprep.subr.bf16.mxu1 %v4606_v1 }
  0x87   : > { %4081 = vmatpush3.bf16.msra.mxu0 %v4362_v48  ;;  %v3514_v48 = vld [vmem:[%s5571_s7 + $0x2] ss:$0 sm:$0xff] }
  0x88   : > { %4082 = vmatprep.subr.bf16.mxu0 %v4606_v1 }
  0x89   : > { %4101 = vmatpush3.bf16.msra.mxu1 %v4402_v0 }
  0x8a   : > { %4102 = vmatprep.subr.bf16.mxu1 %v4606_v1 }
  0x8b   : > { %4083 = vmatpush3.bf16.msra.mxu0 %v4363_v51 }
  0x8c   : > { %4084 = vmatprep.subr.bf16.mxu0 %v4606_v1 }
  0x8d   : > { %4103 = vmatpush3.bf16.msra.mxu1 %v4403_v3  ;;  %v3570_v3 = vld [vmem:[%s5571_s7 + $0x3] ss:$0 sm:$0xff] }
  0x8e   : > { %4104 = vmatprep.subr.bf16.mxu1 %v4606_v1 }
  0x8f   : > { %4085 = vmatpush3.bf16.msra.mxu0 %v4364_v53 }
  0x90   : > { %4086 = vmatprep.subr.bf16.mxu0 %v4606_v1 }
  0x91   : > { %4105 = vmatpush3.bf16.msra.mxu1 %v4404_v5 }
  0x92   : > { %4106 = vmatprep.subr.bf16.mxu1 %v4606_v1 }
  0x93   : > { %4087 = vmatpush3.bf16.msra.mxu0 %v4366_v55 }
  0x94   : > { %4088 = vmatprep.subr.bf16.mxu0 %v4606_v1 }
  0x95   : > { %4107 = vmatpush3.bf16.msra.mxu1 %v4405_v7 }
  0x96   : > { %4108 = vmatprep.subr.bf16.mxu1 %v4606_v1 }
  0x97   : > { %4089 = vmatpush3.bf16.msra.mxu0 %v4368_v57 }
  0x98   : > { %4090 = vmatprep.subr.bf16.mxu0 %v4606_v1 }
  0x99   : > { %4109 = vmatpush3.bf16.msra.mxu1 %v4406_v9 }
  0x9a   : > { %4110 = vmatprep.subr.bf16.mxu1 %v4606_v1 }
  0x9b   : > { %4091 = vmatpush3.bf16.msra.mxu0 %v4370_v59 }
  0x9c   : > { %4116 = vmatprep.subr.bf16.mxu0 %v4606_v1 }
  0x9d   : > { %4111 = vmatpush3.bf16.msra.mxu1 %v4407_v12 }
  0x9e   : > { %4093 = vmatmul.mubr.bf16.vlgmr.msra.gmra.mxu0 %v4809_v11  ;;  %4136 = vmatprep.subr.bf16.mxu1 %v4606_v1 }
  0x9f   : > { %4117 = vmatpush3.bf16.msra.mxu0 %v4372_v61  ;;  %4132 = vmatprep.mubr.msk.bf16.mxu0 %vm4607_vm0, %v4606_v1 }
  0xa0   : > { %4118 = vmatprep.subr.bf16.mxu0 %v4606_v1  ;;  %4113 = vmatmul.mubr.bf16.vlgmr.msra.gmra.mxu1 %v4809_v11 }
  0xa1   : > { %4138 = vmatprep.mubr.msk.bf16.mxu1 %vm4607_vm0, %v4606_v1 }
  0xa3   : > { %4119 = vmatpush3.bf16.msra.mxu0 %v4374_v63 }
  0xa4   : > { %4120 = vmatprep.subr.bf16.mxu0 %v4606_v1 }
  0xa7   : > { %4121 = vmatpush3.bf16.msra.mxu0 %v4376_v2  ;;  %v3540_v2 = vld [vmem:[%s5572_s8 + $0x2] ss:$0 sm:$0xff] }
  0xa8   : > { %4122 = vmatprep.subr.bf16.mxu0 %v4606_v1 }
  0xab   : > { %4123 = vmatpush3.bf16.msra.mxu0 %v4378_v4 }
  0xac   : > { %4124 = vmatprep.subr.bf16.mxu0 %v4606_v1 }
  0xaf   : > { %4125 = vmatpush3.bf16.msra.mxu0 %v4380_v6 }
  0xb0   : > { %4126 = vmatprep.subr.bf16.mxu0 %v4606_v1 }
  0xb3   : > { %4127 = vmatpush3.bf16.msra.mxu0 %v4382_v8 }
  0xb4   : > { %4128 = vmatprep.subr.bf16.mxu0 %v4606_v1 }
  0xb7   : > { %4129 = vmatpush3.bf16.msra.mxu0 %v4384_v10 }
  0xb8   : > { %4130 = vmatprep.subr.bf16.mxu0 %v4606_v1 }
  0xbb   : > { %4131 = vmatpush3.bf16.msra.mxu0 %v4386_v13 }
  0xbc   : > { %4168 = vmatprep.subr.bf16.mxu0 %v4606_v1 }
  0xbe   : > { %4133 = vmatmul.mubr.bf16.vlgmr.msra.gmra.mxu0 %v5098_v16 }
  0xbf   : > { %4170 = vmatprep.mubr.msk.bf16.mxu0 %vm4607_vm0, %v4606_v1 }
  0xfe   : > { %v738_v18 = vpop.f32.mrf.mxu0 }
  0xff   : > { %v739_v19 = vadd.f32 %v3419_v17, %v738_v18 }
 0x100   : > { %v3974_v20 = vpop.f32.mrf.mxu0  ;;  %v850_v29 = vpop.f32.mrf.mxu1 }
 0x101   : > { %v3781_v21 = vpack.c.bf16 %v739_v19, %v739_v19  ;;  %v851_v30 = vadd.f32 %v3428_v27, %v850_v29 }
 0x102   : > { %v741_v11 = vpop.f32.mrf.mxu0  ;;  %v3994_v32 = vpop.f32.mrf.mxu1 }
 0x103   : > { %866 = vst.msk [vmem:[#allocation2] sm:$0xf] %vm865_vm1, %v3781_v21  ;;  %v742_v22 = vadd.f32 %v3419_v17, %v741_v11  ;;  %v3783_v34 = vpack.c.bf16 %v851_v30, %v851_v30 }
 0x104   : > { %v3975_v23 = vpop.f32.mrf.mxu0  ;;  %v853_v36 = vpop.f32.mrf.mxu1 }
 0x105   : > { %v3782_v24 = vpack.c.bf16 %v742_v22, %v742_v22  ;;  %876 = vst.msk [vmem:[#allocation3] sm:$0xf] %vm865_vm1, %v3783_v34  ;;  %v854_v38 = vadd.f32 %v3428_v27, %v853_v36  ;;  %v3596_v23 = vld [vmem:[%s5572_s8 + $0x3] ss:$0 sm:$0xff] }
 0x106   : > { %v3995_v40 = vpop.f32.mrf.mxu1 }
 0x107   : > { %867 = vst.msk [vmem:[#allocation2 + $0x4] sm:$0xf] %vm865_vm1, %v3782_v24  ;;  %v3784_v42 = vpack.c.bf16 %v854_v38, %v854_v38 }
 0x109   : > { %877 = vst.msk [vmem:[#allocation3 + $0x4] sm:$0xf] %vm865_vm1, %v3784_v42 }
 0x10e   : > { %v4408_v25 = vld [vmem:[#allocation2] sm:$0xff]  }
 0x10f   : > { %v1758_v26 = vsel %vm1753_vm2, %v4408_v25, 0 }
 0x110   : > { %4137 = vmatpush3.bf16.xpose.msra.mxu1 %v1758_v26  ;;  %v3609_v26 = vld [vmem:[%s5570_s6] ss:$0 sm:$0xff] }
 0x111   : > { %4142 = vmatprep.subr.bf16.mxu1 %v4606_v1 }
 0x11e   : > { %v985_v31 = vpop.f32.mrf.mxu0 }
 0x11f   : > { %v986_v33 = vadd.f32 %v3458_v28, %v985_v31 }
 0x120   : > { %v4014_v35 = vpop.f32.mrf.mxu0  ;;  %v1099_v49 = vpop.f32.mrf.mxu1 }
 0x121   : > { %v3785_v37 = vpack.c.bf16 %v986_v33, %v986_v33  ;;  %v1100_v50 = vadd.f32 %v3484_v47, %v1099_v49 }
 0x122   : > { %v988_v39 = vpop.f32.mrf.mxu0  ;;  %v4034_v52 = vpop.f32.mrf.mxu1 }
 0x123   : > { %1115 = vst.msk [vmem:[#allocation2 + $0x8] sm:$0xf] %vm865_vm1, %v3785_v37  ;;  %v989_v41 = vadd.f32 %v3458_v28, %v988_v39  ;;  %v3787_v54 = vpack.c.bf16 %v1100_v50, %v1100_v50 }
 0x124   : > { %v4015_v43 = vpop.f32.mrf.mxu0  ;;  %v1102_v56 = vpop.f32.mrf.mxu1 }
 0x125   : > { %v3786_v44 = vpack.c.bf16 %v989_v41, %v989_v41  ;;  %1126 = vst.msk [vmem:[#allocation3 + $0x8] sm:$0xf] %vm865_vm1, %v3787_v54  ;;  %v1103_v58 = vadd.f32 %v3484_v47, %v1102_v56  ;;  %v4410_v41 = vld [vmem:[#allocation3] sm:$0xff]  }
 0x126   : > { %v4035_v60 = vpop.f32.mrf.mxu1 }
 0x127   : > { %1116 = vst.msk [vmem:[#allocation2 + $0xc] sm:$0xf] %vm865_vm1, %v3786_v44  ;;  %v3788_v62 = vpack.c.bf16 %v1103_v58, %v1103_v58  ;;  %v4413_v60 = vld [vmem:[%s5606_s25 + $0x68] sm:$0xff]  }
 0x129   : > { %1127 = vst.msk [vmem:[#allocation3 + $0xc] sm:$0xf] %vm865_vm1, %v3788_v62  ;;  %v4415_v62 = vld [vmem:[%s5606_s25 + $0x58] sm:$0xff]  }
 0x12e   : > { %v4409_v45 = vld [vmem:[#allocation2 + $0x8] sm:$0xff]  }
 0x12f   : > { %v2011_v46 = vsel %vm1753_vm2, %v4409_v45, 0 }
 0x130   : > { %4169 = vmatpush3.bf16.xpose.msra.mxu0 %v2011_v46 }
 0x131   : > { %4174 = vmatprep.subr.bf16.mxu0 %v4606_v1 }
 0x13e   : > { %v1235_v51 = vpop.f32.mrf.mxu0 }
 0x13f   : > { %v1236_v53 = vadd.f32 %v3514_v48, %v1235_v51 }
 0x140   : > { %v4054_v55 = vpop.f32.mrf.mxu0  ;;  %v1349_v4 = vpop.f32.mrf.mxu1 }
 0x141   : > { %v3789_v57 = vpack.c.bf16 %v1236_v53, %v1236_v53  ;;  %v1350_v5 = vadd.f32 %v3540_v2, %v1349_v4 }
 0x142   : > { %v1238_v59 = vpop.f32.mrf.mxu0  ;;  %v4074_v7 = vpop.f32.mrf.mxu1 }
 0x143   : > { %1365 = vst.msk [vmem:[#allocation2 + $0x10] sm:$0xf] %vm865_vm1, %v3789_v57  ;;  %v1239_v61 = vadd.f32 %v3514_v48, %v1238_v59  ;;  %v3791_v9 = vpack.c.bf16 %v1350_v5, %v1350_v5  ;;  %v4411_v57 = vld [vmem:[%s5606_s25 + $0x78] sm:$0xff]   ;;  %v4412_v59 = vld [vmem:[%s5606_s25 + $0x70] sm:$0xff]   ;;  %v3639_v7 = vld [vmem:[%s5570_s6 + $0x1] ss:$0 sm:$0xff] }
 0x144   : > { %v4055_v63 = vpop.f32.mrf.mxu0  ;;  %v1352_v12 = vpop.f32.mrf.mxu1 }
 0x145   : > { %v3790_v0 = vpack.c.bf16 %v1239_v61, %v1239_v61  ;;  %1376 = vst.msk [vmem:[#allocation3 + $0x10] sm:$0xf] %vm865_vm1, %v3791_v9  ;;  %v1353_v17 = vadd.f32 %v3540_v2, %v1352_v12  ;;  %v4414_v61 = vld [vmem:[%s5606_s25 + $0x60] sm:$0xff]   ;;  %v4416_v63 = vld [vmem:[%s5606_s25 + $0x50] sm:$0xff]  }
 0x146   : > { %v4075_v19 = vpop.f32.mrf.mxu1  ;;  %v4418_v2 = vld [vmem:[%s5606_s25 + $0x40] sm:$0xff]  }
 0x147   : > { %1366 = vst.msk [vmem:[#allocation2 + $0x14] sm:$0xf] %vm865_vm1, %v3790_v0  ;;  %v3792_v21 = vpack.c.bf16 %v1353_v17, %v1353_v17  ;;  %v4417_v0 = vld [vmem:[%s5606_s25 + $0x48] sm:$0xff]  }
 0x149   : > { %1377 = vst.msk [vmem:[#allocation3 + $0x14] sm:$0xf] %vm865_vm1, %v3792_v21  ;;  %v4419_v21 = vld [vmem:[#allocation3 + $0x8] sm:$0xff]  }
 0x15e   : > { %v1485_v6 = vpop.f32.mrf.mxu0 }
 0x15f   : > { %v1486_v8 = vadd.f32 %v3570_v3, %v1485_v6 }
 0x160   : > { %v4094_v10 = vpop.f32.mrf.mxu0  ;;  %v1599_v24 = vpop.f32.mrf.mxu1 }
 0x161   : > { %v3793_v13 = vpack.c.bf16 %v1486_v8, %v1486_v8  ;;  %v1600_v25 = vadd.f32 %v3596_v23, %v1599_v24 }
 0x162   : > { %v1488_v18 = vpop.f32.mrf.mxu0  ;;  %v4114_v28 = vpop.f32.mrf.mxu1 }
 0x163   : > { %1615 = vst.msk [vmem:[#allocation2 + $0x18] sm:$0xf] %vm865_vm1, %v3793_v13  ;;  %v1489_v20 = vadd.f32 %v3570_v3, %v1488_v18  ;;  %v3795_v29 = vpack.c.bf16 %v1600_v25, %v1600_v25 }
 0x164   : > { %v4095_v11 = vpop.f32.mrf.mxu0  ;;  %v1602_v31 = vpop.f32.mrf.mxu1 }
 0x165   : > { %v3794_v22 = vpack.c.bf16 %v1489_v20, %v1489_v20  ;;  %1626 = vst.msk [vmem:[#allocation3 + $0x18] sm:$0xf] %vm865_vm1, %v3795_v29  ;;  %v1603_v33 = vadd.f32 %v3596_v23, %v1602_v31 }
 0x166   : > { %v4115_v35 = vpop.f32.mrf.mxu1 }
 0x167   : > { %1616 = vst.msk [vmem:[#allocation2 + $0x1c] sm:$0xf] %vm865_vm1, %v3794_v22  ;;  %v3796_v37 = vpack.c.bf16 %v1603_v33, %v1603_v33 }
 0x169   : > { %1627 = vst.msk [vmem:[#allocation3 + $0x1c] sm:$0xf] %vm865_vm1, %v3796_v37 }
 0x17e   : > { %v1736_v27 = vpop.f32.mrf.mxu0 }
 0x17f   : > { %v1737_v32 = vadd.f32 %v3609_v26, %v1736_v27 }
 0x180   : > { %v4134_v30 = vpop.f32.mrf.mxu0 }
 0x181   : > { %v1743_v39 = vmul.f32 0.17677669, %v1737_v32 }
 0x182   : > { %v1739_v34 = vpop.f32.mrf.mxu0 }
 0x183   : > { %v1740_v36 = vadd.f32 %v3609_v26, %v1739_v34 }
 0x184   : > { %v4135_v38 = vpop.f32.mrf.mxu0 }
 0x185   : > { %v1744_v40 = vmul.f32 0.17677669, %v1740_v36 }
 0x187   : > { %v1745_v42 = vpack.c.bf16 %v1744_v40, %v1743_v39  ;;  %v4420_v40 = vld [vmem:[%s5569_s5 + $0x8] sm:$0xff]  }
 0x189   : > { %4139 = vmatmul.mubr.msk.bf16.vlgmr.msra.gmra.mxu1 %vm1753_vm2, %v1745_v42  ;;  %v4423_v42 = vld [vmem:[%s5569_s5 + $0x18] sm:$0xff]  }
 0x18a   : > { %4143 = vmatpush3.bf16.msra.mxu1 %v4410_v41  ;;  %4144 = vmatprep.mubr.msk.bf16.mxu1 %vm4607_vm0, %v4606_v1  ;;  %v4421_v41 = vld [vmem:[%s5569_s5] sm:$0xff]  }
 0x18b   : > { %4148 = vmatprep.subr.bf16.mxu1 %v4606_v1 }
 0x249   : > { %v1794_v43 = vpop.f32.mrf.mxu1 }
 0x24a   : > { %v1802_v44 = vsel %vm1801_vm3, %v1794_v43, -inf }
 0x24b   : > { %1803 = vmax.xlane.f32.xlu0 %v1802_v44  ;;  %v4140_v45 = vpop.f32.mrf.mxu1 }
 0x24d   : > { %v1797_v46 = vpop.f32.mrf.mxu1 }
 0x24e   : > { %v1805_v47 = vsel %vm1801_vm3, %v1797_v46, -inf }
 0x24f   : > { %1806 = vmax.xlane.f32.xlu0 %v1805_v47  ;;  %v4141_v48 = vpop.f32.mrf.mxu1 }
 0x2d4   : > { %v1804_v49 = vpop.xlane.xlu0 %1803 }
 0x2d5   : > { %v1808_v50 = vsub.f32 %v1794_v43, %v1804_v49  ;;  %v4424_v43 = vld [vmem:[%s5569_s5 + $0x10] sm:$0xff]  }
 0x2d7   : > { %v1810_v51 = vmul.f32 1.442695, %v1808_v50 }
 0x2d8   : > { %v1807_v52 = vpop.xlane.xlu0 %1806 }
 0x2d9   : > { %v1809_v53 = vsub.f32 %v1797_v46, %v1807_v52  ;;  %4488 = vpow2.f32 %v1810_v51  ;;  %v4422_v52 = vld [vmem:[#allocation2 + $0x10] sm:$0xff]  }
 0x2db   : > { %v1812_v54 = vmul.f32 1.442695, %v1809_v53 }
 0x2dd   : > { %4490 = vpow2.f32 %v1812_v54  ;;  %v2377_v54 = vsel %vm1753_vm2, %v4422_v52, 0  ;;  %v4435_v52 = vld [vmem:[%s5569_s5 + $0x28] sm:$0xff]  }
 0x2e6   : > { %v5161_v55 = vpop.eup %4488 }
 0x2e7   : > { %v1814_v36 = vsel %vm1801_vm3, %v5161_v55, 0.0 }
 0x2ea   : > { %v5163_v56 = vpop.eup %4490 }
 0x2eb   : > { %v1820_v58 = vpack.c.bf16 %v5163_v56, %v5161_v55  ;;  %v1817_v39 = vsel %vm1801_vm3, %v5163_v56, 0.0 }
 0x2ed   : > { %4145 = vmatmul.mubr.msk.bf16.vlgmr.msra.gmra.mxu1 %vm1801_vm3, %v1820_v58 }
 0x2ee   : > { %4149 = vmatpush3.bf16.msra.mxu1 %v4411_v57  ;;  %4164 = vmatprep.mubr.msk.bf16.mxu1 %vm4607_vm0, %v4606_v1 }
 0x2ef   : > { %4150 = vmatprep.subr.bf16.mxu1 %v4606_v1 }
 0x2f2   : > { %4151 = vmatpush3.bf16.msra.mxu1 %v4412_v59 }
 0x2f3   : > { %4152 = vmatprep.subr.bf16.mxu1 %v4606_v1 }
 0x2f6   : > { %4153 = vmatpush3.bf16.msra.mxu1 %v4413_v60 }
 0x2f7   : > { %4154 = vmatprep.subr.bf16.mxu1 %v4606_v1 }
 0x2fa   : > { %4155 = vmatpush3.bf16.msra.mxu1 %v4414_v61 }
 0x2fb   : > { %4156 = vmatprep.subr.bf16.mxu1 %v4606_v1 }
 0x2fe   : > { %4157 = vmatpush3.bf16.msra.mxu1 %v4415_v62 }
 0x2ff   : > { %4158 = vmatprep.subr.bf16.mxu1 %v4606_v1 }
 0x302   : > { %4159 = vmatpush3.bf16.msra.mxu1 %v4416_v63  ;;  %v4425_v63 = vld [vmem:[%s5606_s25 + $0xb8] sm:$0xff]  }
 0x303   : > { %4160 = vmatprep.subr.bf16.mxu1 %v4606_v1 }
 0x306   : > { %4161 = vmatpush3.bf16.msra.mxu1 %v4417_v0 }
 0x307   : > { %4162 = vmatprep.subr.bf16.mxu1 %v4606_v1 }
 0x30a   : > { %4163 = vmatpush3.bf16.msra.mxu1 %v4418_v2  ;;  %v4426_v2 = vld [vmem:[%s5606_s25 + $0xb0] sm:$0xff]  }
 0x30b   : > { %4188 = vmatprep.subr.bf16.mxu1 %v4606_v1 }
 0x30d   : > { %4165 = vmatmul.mubr.bf16.vlgmr.msra.gmra.mxu1 %v5098_v16 }
 0x30e   : > { %4192 = vmatprep.mubr.msk.bf16.mxu1 %vm4607_vm0, %v4606_v1  ;;  %4189 = vmatpush3.bf16.msra.mxu1 %v4420_v40 }
 0x30f   : > { %4190 = vmatprep.subr.bf16.mxu1 %v4606_v1 }
 0x312   : > { %4191 = vmatpush3.bf16.msra.mxu1 %v4421_v41 }
 0x313   : > { %4216 = vmatprep.subr.bf16.mxu1 %v4606_v1 }
 0x3ad   : > { %v5205_v3 = vpop.f32.mrf.mxu1 }
 0x3af   : > { %v4146_v4 = vpop.f32.mrf.mxu1 }
 0x3b0   : > { %v4428_v4 = vld [vmem:[%s5606_s25 + $0xa0] sm:$0xff]  }
 0x3b1   : > { %v5207_v5 = vpop.f32.mrf.mxu1 }
 0x3b3   : > { %v4147_v6 = vpop.f32.mrf.mxu1 }
 0x3b4   : > { %v4430_v6 = vld [vmem:[%s5606_s25 + $0x90] sm:$0xff]  }
 0x3cd   : > { %v1989_v8 = vpop.f32.mrf.mxu1 }
 0x3ce   : > { %v1990_v10 = vadd.f32 %v3639_v7, %v1989_v8  ;;  %v4432_v8 = vld [vmem:[%s5606_s25 + $0x80] sm:$0xff]  }
 0x3cf   : > { %v4166_v9 = vpop.f32.mrf.mxu1 }
 0x3d0   : > { %v1996_v18 = vmul.f32 0.17677669, %v1990_v10  ;;  %v4433_v9 = vld [vmem:[#allocation2 + $0x18] sm:$0xff]  }
 0x3d1   : > { %v1992_v12 = vpop.f32.mrf.mxu1  ;;  %v2689_v10 = vsel %vm1753_vm2, %v4433_v9, 0  ;;  %v4444_v9 = vld [vmem:[%s5606_s25 + $0xc0] sm:$0xff]  }
 0x3d2   : > { %v1993_v13 = vadd.f32 %v3639_v7, %v1992_v12  ;;  %v4431_v7 = vld [vmem:[%s5606_s25 + $0x88] sm:$0xff]  }
 0x3d3   : > { %v4167_v17 = vpop.f32.mrf.mxu1 }
 0x3d4   : > { %v1997_v19 = vmul.f32 0.17677669, %v1993_v13 }
 0x3d6   : > { %v1998_v20 = vpack.c.bf16 %v1997_v19, %v1996_v18 }
 0x3d8   : > { %4171 = vmatmul.mubr.msk.bf16.vlgmr.msra.gmra.mxu0 %vm1753_vm2, %v1998_v20 }
 0x3d9   : > { %4175 = vmatpush3.bf16.msra.mxu0 %v4419_v21  ;;  %4176 = vmatprep.mubr.msk.bf16.mxu0 %vm4607_vm0, %v4606_v1 }
 0x3da   : > { %4180 = vmatprep.subr.bf16.mxu0 %v4606_v1 }
 0x498   : > { %v2047_v11 = vpop.f32.mrf.mxu0 }
 0x499   : > { %v2054_v22 = vsel %vm1801_vm3, %v2047_v11, -inf }
 0x49a   : > { %2055 = vmax.xlane.f32.xlu1 %v2054_v22  ;;  %v4172_v23 = vpop.f32.mrf.mxu0 }
 0x49c   : > { %v2050_v24 = vpop.f32.mrf.mxu0 }
 0x49d   : > { %v2057_v25 = vsel %vm1801_vm3, %v2050_v24, -inf }
 0x49e   : > { %2058 = vmax.xlane.f32.xlu1 %v2057_v25  ;;  %v4173_v26 = vpop.f32.mrf.mxu0 }
 0x523   : > { %v2056_v27 = vpop.xlane.xlu1 %2055 }
 0x524   : > { %v2060_v28 = vsub.f32 %v2047_v11, %v2056_v27 }
 0x526   : > { %v2062_v29 = vmul.f32 1.442695, %v2060_v28 }
 0x527   : > { %v2059_v30 = vpop.xlane.xlu1 %2058 }
 0x528   : > { %4492 = vpow2.f32 %v2062_v29  ;;  %v2061_v31 = vsub.f32 %v2050_v24, %v2059_v30  ;;  %v3679_v24 = vld [vmem:[%s5570_s6 + $0x2] ss:$0 sm:$0xff] }
 0x52a   : > { %v2064_v32 = vmul.f32 1.442695, %v2061_v31 }
 0x52c   : > { %4494 = vpow2.f32 %v2064_v32 }
 0x535   : > { %v4493_v33 = vpop.eup %4492 }
 0x536   : > { %v2066_v34 = vsel %vm1801_vm3, %v4493_v33, 0.0 }
 0x537   : > { %2067 = vadd.xlane.f32.xlu0 %v2066_v34  ;;  %v4434_v34 = vld [vmem:[#allocation3 + $0x10] sm:$0xff]  }
 0x539   : > { %v4495_v35 = vpop.eup %4494 }
 0x53a   : > { %v2069_v37 = vsel %vm1801_vm3, %v4495_v35, 0.0  ;;  %v2072_v38 = vpack.c.bf16 %v4495_v35, %v4493_v33 }
 0x53b   : > { %1815 = vadd.xlane.f32.xlu0 %v1814_v36  ;;  %2070 = vadd.xlane.f32.xlu1 %v2069_v37 }
 0x53c   : > { %4177 = vmatmul.mubr.msk.bf16.vlgmr.msra.gmra.mxu0 %vm1801_vm3, %v2072_v38 }
 0x53d   : > { %4184 = vmatprep.mubr.msk.bf16.mxu0 %vm4607_vm0, %v4606_v1  ;;  %4181 = vmatpush3.bf16.msra.mxu0 %v4423_v42 }
 0x53e   : > { %4182 = vmatprep.subr.bf16.mxu0 %v4606_v1 }
 0x53f   : > { %1818 = vadd.xlane.f32.xlu1 %v1817_v39 }
 0x541   : > { %4183 = vmatpush3.bf16.msra.mxu0 %v4424_v43 }
 0x542   : > { %4196 = vmatprep.subr.bf16.mxu0 %v4606_v1 }
 0x5c0   : > { %v2068_v44 = vpop.xlane.xlu0 %2067 }
 0x5c4   : > { %v1816_v45 = vpop.xlane.xlu0 %1815  ;;  %v2071_v46 = vpop.xlane.xlu1 %2070 }
 0x5c5   : > { %4496 = vrcp.f32 %v1816_v45 }
 0x5c8   : > { %v1819_v47 = vpop.xlane.xlu1 %1818 }
 0x5c9   : > { %4498 = vrcp.f32 %v1819_v47 }
 0x5ca   : > { %4500 = vrcp.f32 %v2068_v44 }
 0x5cb   : > { %4502 = vrcp.f32 %v2071_v46 }
 0x5d2   : > { %v4497_v48 = vpop.eup %4496 }
 0x5d3   : > { %v1875_v50 = vmul.f32 %v4497_v48, %v5205_v3  ;;  %v4427_v3 = vld [vmem:[%s5606_s25 + $0xa8] sm:$0xff]  }
 0x5d6   : > { %v4499_v49 = vpop.eup %4498 }
 0x5d7   : > { %v1876_v51 = vmul.f32 %v4499_v49, %v5207_v5  ;;  %v4501_v57 = vpop.eup %4500  ;;  %v4429_v5 = vld [vmem:[%s5606_s25 + $0x98] sm:$0xff]  }
 0x5d8   : > { %v4503_v58 = vpop.eup %4502 }
 0x5d9   : > { %v1877_v53 = vpack.c.bf16 %v1876_v51, %v1875_v50 }
 0x5db   : > { %4193 = vmatmul.mubr.msk.bf16.vlgmr.msra.gmra.mxu1 %vm1753_vm2, %v1877_v53  ;;  %v4436_v53 = vld [vmem:[%s5569_s5 + $0x20] sm:$0xff]  }
 0x5dc   : > { %4217 = vmatpush3.bf16.xpose.msra.mxu1 %v2377_v54  ;;  %4218 = vmatprep.mubr.msk.bf16.mxu1 %vm4607_vm0, %v4606_v1 }
 0x5dd   : > { %4222 = vmatprep.subr.bf16.mxu1 %v4606_v1 }
 0x5fc   : > { %v2119_v55 = vpop.f32.mrf.mxu0 }
 0x5fd   : > { %v2128_v60 = vmul.f32 %v4501_v57, %v2119_v55 }
 0x5fe   : > { %v4178_v56 = vpop.f32.mrf.mxu0 }
 0x600   : > { %v2122_v59 = vpop.f32.mrf.mxu0 }
 0x601   : > { %v2129_v61 = vmul.f32 %v4503_v58, %v2122_v59 }
 0x602   : > { %v4179_v62 = vpop.f32.mrf.mxu0 }
 0x603   : > { %v2130_v0 = vpack.c.bf16 %v2129_v61, %v2128_v60 }
 0x605   : > { %4185 = vmatmul.mubr.msk.bf16.vlgmr.msra.gmra.mxu0 %vm1753_vm2, %v2130_v0  ;;  %v4437_v0 = vld [vmem:[%s5606_s25 + $0xf8] sm:$0xff]  }
 0x606   : > { %4197 = vmatpush3.bf16.msra.mxu0 %v4425_v63  ;;  %4212 = vmatprep.mubr.msk.bf16.mxu0 %vm4607_vm0, %v4606_v1 }
 0x607   : > { %4198 = vmatprep.subr.bf16.mxu0 %v4606_v1 }
 0x60a   : > { %4199 = vmatpush3.bf16.msra.mxu0 %v4426_v2 }
 0x60b   : > { %4200 = vmatprep.subr.bf16.mxu0 %v4606_v1 }
 0x60e   : > { %4201 = vmatpush3.bf16.msra.mxu0 %v4427_v3  ;;  %v4438_v3 = vld [vmem:[%s5606_s25 + $0xf0] sm:$0xff]  }
 0x60f   : > { %4202 = vmatprep.subr.bf16.mxu0 %v4606_v1 }
 0x612   : > { %4203 = vmatpush3.bf16.msra.mxu0 %v4428_v4  ;;  %v4439_v4 = vld [vmem:[%s5606_s25 + $0xe8] sm:$0xff]  }
 0x613   : > { %4204 = vmatprep.subr.bf16.mxu0 %v4606_v1 }
 0x616   : > { %4205 = vmatpush3.bf16.msra.mxu0 %v4429_v5  ;;  %v4440_v5 = vld [vmem:[%s5606_s25 + $0xe0] sm:$0xff]  }
 0x617   : > { %4206 = vmatprep.subr.bf16.mxu0 %v4606_v1 }
 0x61a   : > { %4207 = vmatpush3.bf16.msra.mxu0 %v4430_v6  ;;  %v4441_v6 = vld [vmem:[%s5606_s25 + $0xd8] sm:$0xff]  }
 0x61b   : > { %4208 = vmatprep.subr.bf16.mxu0 %v4606_v1 }
 0x61e   : > { %4209 = vmatpush3.bf16.msra.mxu0 %v4431_v7  ;;  %v4442_v7 = vld [vmem:[%s5606_s25 + $0xd0] sm:$0xff]  }
 0x61f   : > { %4210 = vmatprep.subr.bf16.mxu0 %v4606_v1 }
 0x622   : > { %4211 = vmatpush3.bf16.msra.mxu0 %v4432_v8  ;;  %v4443_v8 = vld [vmem:[%s5606_s25 + $0xc8] sm:$0xff]  }
 0x623   : > { %4256 = vmatprep.subr.bf16.mxu0 %v4606_v1 }
 0x625   : > { %4213 = vmatmul.mubr.bf16.vlgmr.msra.gmra.mxu0 %v5098_v16 }
 0x626   : > { %4257 = vmatpush3.bf16.xpose.msra.mxu0 %v2689_v10  ;;  %4258 = vmatprep.mubr.msk.bf16.mxu0 %vm4607_vm0, %v4606_v1 }
 0x627   : > { %4262 = vmatprep.subr.bf16.mxu0 %v4606_v1 }
 0x69b   : > { %v2241_v12 = vpop.f32.mrf.mxu1 }
 0x69d   : > { %v4194_v13 = vpop.f32.mrf.mxu1 }
 0x69f   : > { %v2244_v17 = vpop.f32.mrf.mxu1 }
 0x6a1   : > { %v4195_v18 = vpop.f32.mrf.mxu1 }
 0x6c5   : > { %v2185_v19 = vpop.f32.mrf.mxu0 }
 0x6c6   : > { %v5290_v20 = vadd.f32 %v2241_v12, %v2185_v19 }
 0x6c7   : > { %v4186_v21 = vpop.f32.mrf.mxu0 }
 0x6c8   : > { %v3716_v21 = vld [vmem:[%s5570_s6 + $0x3] ss:$0 sm:$0xff] }
 0x6c9   : > { %v2188_v11 = vpop.f32.mrf.mxu0 }
 0x6ca   : > { %v5292_v22 = vadd.f32 %v2244_v17, %v2188_v11 }
 0x6cb   : > { %v4187_v23 = vpop.f32.mrf.mxu0 }
 0x6e5   : > { %v2355_v25 = vpop.f32.mrf.mxu0 }
 0x6e6   : > { %v2356_v27 = vadd.f32 %v3679_v24, %v2355_v25 }
 0x6e7   : > { %v4214_v26 = vpop.f32.mrf.mxu0 }
 0x6e8   : > { %v2362_v31 = vmul.f32 0.17677669, %v2356_v27 }
 0x6e9   : > { %v2358_v28 = vpop.f32.mrf.mxu0 }
 0x6ea   : > { %v2359_v29 = vadd.f32 %v3679_v24, %v2358_v28 }
 0x6eb   : > { %v4215_v30 = vpop.f32.mrf.mxu0 }
 0x6ec   : > { %v2363_v32 = vmul.f32 0.17677669, %v2359_v29  ;;  %v4445_v29 = vld [vmem:[#allocation3 + $0x18] sm:$0xff]  }
 0x6ee   : > { %v2364_v33 = vpack.c.bf16 %v2363_v32, %v2362_v31 }
 0x6f0   : > { %4219 = vmatmul.mubr.msk.bf16.vlgmr.msra.gmra.mxu1 %vm1753_vm2, %v2364_v33 }
 0x6f1   : > { %4223 = vmatpush3.bf16.msra.mxu1 %v4434_v34  ;;  %4224 = vmatprep.mubr.msk.bf16.mxu1 %vm4607_vm0, %v4606_v1 }
 0x6f2   : > { %4228 = vmatprep.subr.bf16.mxu1 %v4606_v1 }
 0x7b0   : > { %v2413_v35 = vpop.f32.mrf.mxu1 }
 0x7b1   : > { %v2420_v36 = vsel %vm1801_vm3, %v2413_v35, -inf }
 0x7b2   : > { %2421 = vmax.xlane.f32.xlu0 %v2420_v36  ;;  %v4220_v37 = vpop.f32.mrf.mxu1 }
 0x7b4   : > { %v2416_v38 = vpop.f32.mrf.mxu1 }
 0x7b5   : > { %v2423_v39 = vsel %vm1801_vm3, %v2416_v38, -inf }
 0x7b6   : > { %2424 = vmax.xlane.f32.xlu1 %v2423_v39  ;;  %v4221_v40 = vpop.f32.mrf.mxu1 }
 0x83b   : > { %v2422_v41 = vpop.xlane.xlu0 %2421 }
 0x83c   : > { %v2426_v42 = vsub.f32 %v2413_v35, %v2422_v41 }
 0x83e   : > { %v2428_v43 = vmul.f32 1.442695, %v2426_v42 }
 0x83f   : > { %v2425_v44 = vpop.xlane.xlu1 %2424 }
 0x840   : > { %4504 = vpow2.f32 %v2428_v43  ;;  %v2427_v45 = vsub.f32 %v2416_v38, %v2425_v44 }
 0x842   : > { %v2430_v46 = vmul.f32 1.442695, %v2427_v45 }
 0x844   : > { %4506 = vpow2.f32 %v2430_v46  ;;  %v4446_v46 = vld [vmem:[%s5569_s5 + $0x38] sm:$0xff]  }
 0x84d   : > { %v4505_v47 = vpop.eup %4504 }
 0x84e   : > { %v2432_v48 = vsel %vm1801_vm3, %v4505_v47, 0.0 }
 0x84f   : > { %2433 = vadd.xlane.f32.xlu0 %v2432_v48 }
 0x851   : > { %v4507_v49 = vpop.eup %4506 }
 0x852   : > { %v2435_v50 = vsel %vm1801_vm3, %v4507_v49, 0.0  ;;  %v2438_v51 = vpack.c.bf16 %v4507_v49, %v4505_v47  ;;  %v4447_v47 = vld [vmem:[%s5569_s5 + $0x30] sm:$0xff]  }
 0x853   : > { %2436 = vadd.xlane.f32.xlu1 %v2435_v50 }
 0x854   : > { %4225 = vmatmul.mubr.msk.bf16.vlgmr.msra.gmra.mxu1 %vm1801_vm3, %v2438_v51 }
 0x855   : > { %4232 = vmatprep.mubr.msk.bf16.mxu1 %vm4607_vm0, %v4606_v1  ;;  %4229 = vmatpush3.bf16.msra.mxu1 %v4435_v52 }
 0x856   : > { %4230 = vmatprep.subr.bf16.mxu1 %v4606_v1 }
 0x859   : > { %4231 = vmatpush3.bf16.msra.mxu1 %v4436_v53 }
 0x85a   : > { %4236 = vmatprep.subr.bf16.mxu1 %v4606_v1 }
 0x8d8   : > { %v2434_v54 = vpop.xlane.xlu0 %2433 }
 0x8d9   : > { %4508 = vrcp.f32 %v2434_v54 }
 0x8dc   : > { %v2437_v55 = vpop.xlane.xlu1 %2436 }
 0x8dd   : > { %4510 = vrcp.f32 %v2437_v55 }
 0x8e6   : > { %v4509_v58 = vpop.eup %4508 }
 0x8ea   : > { %v4511_v59 = vpop.eup %4510 }
 0x914   : > { %v2485_v56 = vpop.f32.mrf.mxu1 }
 0x915   : > { %v2494_v61 = vmul.f32 %v4509_v58, %v2485_v56 }
 0x916   : > { %v4226_v57 = vpop.f32.mrf.mxu1 }
 0x918   : > { %v2488_v60 = vpop.f32.mrf.mxu1 }
 0x919   : > { %v2495_v62 = vmul.f32 %v4511_v59, %v2488_v60  ;;  %v3736_v59 = vld [vmem:[%s5573_s9] ss:$0 sm:$0xff] }
 0x91a   : > { %v4227_v63 = vpop.f32.mrf.mxu1 }
 0x91b   : > { %v2496_v2 = vpack.c.bf16 %v2495_v62, %v2494_v61 }
 0x91d   : > { %4233 = vmatmul.mubr.msk.bf16.vlgmr.msra.gmra.mxu1 %vm1753_vm2, %v2496_v2 }
 0x91e   : > { %4237 = vmatpush3.bf16.msra.mxu1 %v4437_v0  ;;  %4252 = vmatprep.mubr.msk.bf16.mxu1 %vm4607_vm0, %v4606_v1 }
 0x91f   : > { %4238 = vmatprep.subr.bf16.mxu1 %v4606_v1 }
 0x922   : > { %4239 = vmatpush3.bf16.msra.mxu1 %v4438_v3 }
 0x923   : > { %4240 = vmatprep.subr.bf16.mxu1 %v4606_v1 }
 0x926   : > { %4241 = vmatpush3.bf16.msra.mxu1 %v4439_v4 }
 0x927   : > { %4242 = vmatprep.subr.bf16.mxu1 %v4606_v1 }
 0x92a   : > { %4243 = vmatpush3.bf16.msra.mxu1 %v4440_v5 }
 0x92b   : > { %4244 = vmatprep.subr.bf16.mxu1 %v4606_v1 }
 0x92e   : > { %4245 = vmatpush3.bf16.msra.mxu1 %v4441_v6  ;;  %v4448_v6 = vld [vmem:[%s5576_s12 + $0x70] ss:$8 sps:$4 sm:$0xff]  }
 0x92f   : > { %4246 = vmatprep.subr.bf16.mxu1 %v4606_v1 }
 0x932   : > { %4247 = vmatpush3.bf16.msra.mxu1 %v4442_v7  ;;  %v4450_v7 = vld [vmem:[%s5576_s12 + $0x74] ss:$8 sps:$4 sm:$0xff]  }
 0x933   : > { %4248 = vmatprep.subr.bf16.mxu1 %v4606_v1 }
 0x936   : > { %4249 = vmatpush3.bf16.msra.mxu1 %v4443_v8 }
 0x937   : > { %4250 = vmatprep.subr.bf16.mxu1 %v4606_v1 }
 0x93a   : > { %4251 = vmatpush3.bf16.msra.mxu1 %v4444_v9 }
 0x93d   : > { %4253 = vmatmul.mubr.bf16.vlgmr.msra.gmra.mxu1 %v5098_v16 }
 0x9dd   : > { %v2551_v10 = vpop.f32.mrf.mxu1 }
 0x9de   : > { %v5352_v12 = vadd.f32 %v2551_v10, %v5290_v20 }
 0x9df   : > { %v4234_v13 = vpop.f32.mrf.mxu1 }
 0x9e1   : > { %v2554_v17 = vpop.f32.mrf.mxu1 }
 0x9e2   : > { %v5355_v18 = vadd.f32 %v2554_v17, %v5292_v22 }
 0x9e3   : > { %v4235_v19 = vpop.f32.mrf.mxu1 }
 0x9e4   : > { %v4451_v19 = vld [vmem:[%s5576_s12 + $0x60] ss:$8 sps:$4 sm:$0xff]  }
 0x9fd   : > { %v2667_v11 = vpop.f32.mrf.mxu1 }
 0x9fe   : > { %v2668_v24 = vadd.f32 %v3716_v21, %v2667_v11  ;;  %v4454_v11 = vld [vmem:[%s5576_s12 + $0x50] ss:$8 sps:$4 sm:$0xff]  }
 0x9ff   : > { %v4254_v23 = vpop.f32.mrf.mxu1 }
 0xa00   : > { %v2674_v27 = vmul.f32 0.17677669, %v2668_v24  ;;  %v4457_v23 = vld [vmem:[%s5576_s12 + $0x40] ss:$8 sps:$4 sm:$0xff]   ;;  %v4459_v24 = vld [vmem:[%s5576_s12 + $0x44] ss:$8 sps:$4 sm:$0xff]  }
 0xa01   : > { %v2670_v25 = vpop.f32.mrf.mxu1 }
 0xa02   : > { %v2671_v26 = vadd.f32 %v3716_v21, %v2670_v25  ;;  %v4456_v21 = vld [vmem:[%s5576_s12 + $0x54] ss:$8 sps:$4 sm:$0xff]  }
 0xa03   : > { %v4255_v16 = vpop.f32.mrf.mxu1  ;;  %v4462_v25 = vld [vmem:[%s5576_s12 + $0x34] ss:$8 sps:$4 sm:$0xff]  }
 0xa04   : > { %v2675_v28 = vmul.f32 0.17677669, %v2671_v26  ;;  %v4460_v26 = vld [vmem:[%s5576_s12 + $0x30] ss:$8 sps:$4 sm:$0xff]   ;;  %v4608_v16 = vmov 0  }
 0xa06   : > { %v2676_v20 = vpack.c.bf16 %v2675_v28, %v2674_v27  ;;  %v4465_v27 = vld [vmem:[%s5576_s12 + $0x24] ss:$8 sps:$4 sm:$0xff]   ;;  %v4463_v28 = vld [vmem:[%s5576_s12 + $0x20] ss:$8 sps:$4 sm:$0xff]  }
 0xa08   : > { %4259 = vmatmul.mubr.msk.bf16.vlgmr.msra.gmra.mxu0 %vm1753_vm2, %v2676_v20  ;;  %v4468_v20 = vld [vmem:[%s5576_s12 + $0x14] ss:$8 sps:$4 sm:$0xff]  }
 0xa09   : > { %4263 = vmatpush3.bf16.msra.mxu0 %v4445_v29  ;;  %4264 = vmatprep.mubr.msk.bf16.mxu0 %vm4607_vm0, %v4606_v1  ;;  %v4466_v29 = vld [vmem:[%s5576_s12 + $0x10] ss:$8 sps:$4 sm:$0xff]  }
 0xa0a   : > { %4268 = vmatprep.subr.bf16.mxu0 %v4606_v1 }
 0xac8   : > { %v2725_v22 = vpop.f32.mrf.mxu0 }
 0xac9   : > { %v2732_v30 = vsel %vm1801_vm3, %v2725_v22, -inf }
 0xaca   : > { %2733 = vmax.xlane.f32.xlu0 %v2732_v30  ;;  %v4260_v31 = vpop.f32.mrf.mxu0  ;;  %v4469_v30 = vld [vmem:[%s5576_s12] ss:$8 sps:$4 sm:$0xff]  }
 0xacb   : > { %v4472_v31 = vld [vmem:[%s5578_s14 + $0x78] sm:$0xff]  }
 0xacc   : > { %v2728_v32 = vpop.f32.mrf.mxu0  ;;  %3934 = vmatprep.subr.bf16.mxu1 %v4472_v31 }
 0xacd   : > { %v2735_v33 = vsel %vm1801_vm3, %v2728_v32, -inf }
 0xace   : > { %2736 = vmax.xlane.f32.xlu1 %v2735_v33  ;;  %v4261_v34 = vpop.f32.mrf.mxu0  ;;  %v4474_v33 = vld [vmem:[%s5578_s14 + $0x70] sm:$0xff]  }
 0xacf   : > { %v4475_v34 = vld [vmem:[%s5578_s14 + $0x30] sm:$0xff]  }
 0xb53   : > { %v2734_v35 = vpop.xlane.xlu0 %2733 }
 0xb54   : > { %v2738_v36 = vsub.f32 %v2725_v22, %v2734_v35  ;;  %v4471_v22 = vld [vmem:[%s5576_s12 + $0x4] ss:$8 sps:$4 sm:$0xff]  }
 0xb55   : > { %v4476_v35 = vld [vmem:[%s5578_s14 + $0x68] sm:$0xff]  }
 0xb56   : > { %v2740_v37 = vmul.f32 1.442695, %v2738_v36  ;;  %v4477_v36 = vld [vmem:[%s5578_s14 + $0x28] sm:$0xff]  }
 0xb57   : > { %v2737_v38 = vpop.xlane.xlu1 %2736 }
 0xb58   : > { %4512 = vpow2.f32 %v2740_v37  ;;  %v2739_v39 = vsub.f32 %v2728_v32, %v2737_v38  ;;  %v4473_v32 = vld [vmem:[%s5578_s14 + $0x38] sm:$0xff]   ;;  %v4478_v37 = vld [vmem:[%s5578_s14 + $0x60] sm:$0xff]  }
 0xb59   : > { %3935 = vmatpush3.bf16.msra.mxu1 %v4473_v32  ;;  %v4479_v38 = vld [vmem:[%s5578_s14 + $0x20] sm:$0xff]  }
 0xb5a   : > { %v2742_v40 = vmul.f32 1.442695, %v2739_v39  ;;  %3936 = vmatprep.subr.bf16.mxu1 %v4474_v33  ;;  %v4480_v39 = vld [vmem:[%s5578_s14 + $0x58] sm:$0xff]  }
 0xb5c   : > { %4514 = vpow2.f32 %v2742_v40  ;;  %v4481_v40 = vld [vmem:[%s5578_s14 + $0x18] sm:$0xff]  }
 0xb5d   : > { %3937 = vmatpush3.bf16.msra.mxu1 %v4475_v34 }
 0xb5e   : > { %3938 = vmatprep.subr.bf16.mxu1 %v4476_v35 }
 0xb61   : > { %3939 = vmatpush3.bf16.msra.mxu1 %v4477_v36 }
 0xb62   : > { %3940 = vmatprep.subr.bf16.mxu1 %v4478_v37 }
 0xb65   : > { %v4513_v41 = vpop.eup %4512  ;;  %3941 = vmatpush3.bf16.msra.mxu1 %v4479_v38 }
 0xb66   : > { %v2744_v42 = vsel %vm1801_vm3, %v4513_v41, 0.0  ;;  %3942 = vmatprep.subr.bf16.mxu1 %v4480_v39 }
 0xb67   : > { %2745 = vadd.xlane.f32.xlu0 %v2744_v42 }
 0xb69   : > { %v4515_v43 = vpop.eup %4514  ;;  %3943 = vmatpush3.bf16.msra.mxu1 %v4481_v40 }
 0xb6a   : > { %v2747_v44 = vsel %vm1801_vm3, %v4515_v43, 0.0  ;;  %v2750_v45 = vpack.c.bf16 %v4515_v43, %v4513_v41 }
 0xb6b   : > { %2748 = vadd.xlane.f32.xlu1 %v2747_v44 }
 0xb6c   : > { %4265 = vmatmul.mubr.msk.bf16.vlgmr.msra.gmra.mxu0 %vm1801_vm3, %v2750_v45 }
 0xb6d   : > { %4272 = vmatprep.mubr.msk.bf16.mxu0 %vm4607_vm0, %v4606_v1  ;;  %4269 = vmatpush3.bf16.msra.mxu0 %v4446_v46 }
 0xb6e   : > { %4270 = vmatprep.subr.bf16.mxu0 %v4606_v1 }
 0xb71   : > { %4271 = vmatpush3.bf16.msra.mxu0 %v4447_v47 }
 0xb72   : > { %3033 = vmatprep.subr.bf16.mxu0 %v4450_v7 }
 0xbf0   : > { %v2746_v48 = vpop.xlane.xlu0 %2745 }
 0xbf1   : > { %4516 = vrcp.f32 %v2746_v48 }
 0xbf4   : > { %v2749_v49 = vpop.xlane.xlu1 %2748 }
 0xbf5   : > { %4518 = vrcp.f32 %v2749_v49  ;;  %v3737_v49 = vld [vmem:[%s5574_s10] ss:$0 sm:$0xff] }
 0xbfe   : > { %v4517_v52 = vpop.eup %4516 }
 0xc02   : > { %v4519_v53 = vpop.eup %4518 }
 0xc2c   : > { %v2797_v50 = vpop.f32.mrf.mxu0 }
 0xc2d   : > { %v2806_v55 = vmul.f32 %v4517_v52, %v2797_v50 }
 0xc2e   : > { %v4266_v51 = vpop.f32.mrf.mxu0 }
 0xc30   : > { %v2800_v54 = vpop.f32.mrf.mxu0 }
 0xc31   : > { %v2807_v56 = vmul.f32 %v4519_v53, %v2800_v54  ;;  %v3738_v53 = vld [vmem:[%s5575_s11] ss:$0 sm:$0xff] }
 0xc32   : > { %v4267_v57 = vpop.f32.mrf.mxu0 }
 0xc33   : > { %v2808_v58 = vpack.c.bf16 %v2807_v56, %v2806_v55 }
 0xc35   : > { %4273 = vmatmul.mubr.msk.bf16.vlgmr.msra.gmra.mxu0 %vm1753_vm2, %v2808_v58  ;;  %v4482_v58 = vld [vmem:[%s5578_s14 + $0x50] sm:$0xff]  }
 0xc36   : > { %3034 = vmatpush1.bf16.msra.mxu0 %v4448_v6  ;;  %3065 = vmatprep.mubr.bf16.mxu0 %v4608_v16 }
 0xc37   : > { %3944 = vmatprep.subr.bf16.mxu1 %v4482_v58 }
 0xcf5   : > { %v2863_v1 = vpop.f32.mrf.mxu0 }
 0xcf6   : > { %v2870_v60 = vadd.f32 %v2863_v1, %v5352_v12  ;;  %v4483_v1 = vld [vmem:[%s5578_s14 + $0x10] sm:$0xff]  }
 0xcf7   : > { %v4274_v61 = vpop.f32.mrf.mxu0  ;;  %3945 = vmatpush3.bf16.msra.mxu1 %v4483_v1 }
 0xcf8   : > { %v2879_v62 = vadd.f32 %v3736_v59, %v2870_v60  ;;  %v4485_v60 = vld [vmem:[%s5578_s14 + $0x8] sm:$0xff]   ;;  %v4486_v61 = vld [vmem:[%s5578_s14 + $0x40] sm:$0xff]  }
 0xcf9   : > { %v2866_v63 = vpop.f32.mrf.mxu0 }
 0xcfa   : > { %v2871_v0 = vadd.f32 %v2866_v63, %v5355_v18  ;;  %v2881_v2 = vadd.f32 %v2879_v62, %v5091_v14  ;;  %v4453_v18 = vld [vmem:[%s5576_s12 + $0x64] ss:$8 sps:$4 sm:$0xff]   ;;  %v2943_v63 = vlaneseq }
 0xcfb   : > { %v4275_v3 = vpop.f32.mrf.mxu0  ;;  %3035 = vmatprep.subr.bf16.mxu0 %v4453_v18  ;;  %v4487_v62 = vld [vmem:[%s5578_s14] sm:$0xff]  }
 0xcfc   : > { %v2880_v4 = vadd.f32 %v3736_v59, %v2871_v0  ;;  %2885 = vadd.xlane.f32.xlu0 %v2881_v2  ;;  %3036 = vmatpush1.bf16.msra.mxu0 %v4451_v19  ;;  %v4484_v59 = vld [vmem:[%s5578_s14 + $0x48] sm:$0xff]   ;;  %v2944_v0 = vshrl.u32 %v2943_v63, 7 }
 0xcfd   : > { %3037 = vmatprep.subr.bf16.mxu0 %v4456_v21  ;;  %3946 = vmatprep.subr.bf16.mxu1 %v4484_v59 }
 0xcfe   : > { %v2882_v5 = vadd.f32 %v2880_v4, %v5093_v15  ;;  %3947 = vmatpush3.bf16.msra.mxu1 %v4485_v60  ;;  %v2945_v3 = vsub.s32 0, %v2944_v0  ;;  %v2941_v4 = vld [vmem:[%s5577_s13] sm:$0x3] }
 0xcff   : > { %3948 = vmatprep.subr.bf16.mxu1 %v4486_v61 }
 0xd00   : > { %2887 = vadd.xlane.f32.xlu1 %v2882_v5  ;;  %3038 = vmatpush1.bf16.msra.mxu0 %v4454_v11  ;;  %v2946_v7 = vrot.slane %v2941_v4, %v2945_v3 }
 0xd01   : > { %3039 = vmatprep.subr.bf16.mxu0 %v4459_v24 }
 0xd02   : > { %3949 = vmatpush3.bf16.msra.mxu1 %v4487_v62 }
 0xd04   : > { %3040 = vmatpush1.bf16.msra.mxu0 %v4457_v23 }
 0xd05   : > { %3041 = vmatprep.subr.bf16.mxu0 %v4462_v25  ;;  %v3755_v25 = vld [vmem:[%s5579_s15] ss:$0 sm:$0xff] }
 0xd08   : > { %3042 = vmatpush1.bf16.msra.mxu0 %v4460_v26 }
 0xd09   : > { %3043 = vmatprep.subr.bf16.mxu0 %v4465_v27 }
 0xd0c   : > { %3044 = vmatpush1.bf16.msra.mxu0 %v4463_v28 }
 0xd0d   : > { %3045 = vmatprep.subr.bf16.mxu0 %v4468_v20 }
 0xd10   : > { %3046 = vmatpush1.bf16.msra.mxu0 %v4466_v29 }
 0xd11   : > { %3047 = vmatprep.subr.bf16.mxu0 %v4471_v22 }
 0xd14   : > { %3048 = vmatpush1.bf16.msra.mxu0 %v4469_v30 }
 0xd85   : > { %v2886_v8 = vpop.xlane.xlu0 %2885 }
 0xd86   : > { %v2890_v9 = vmul.f32 0.0078125, %v2886_v8 }
 0xd88   : > { %v5392_v10 = vsub.f32 %v2881_v2, %v2890_v9  ;;  %v2949_v2 = vsub.s32 1, %v2944_v0 }
 0xd89   : > { %v2888_v14 = vpop.xlane.xlu1 %2887 }
 0xd8a   : > { %v2891_v12 = vmul.f32 0.0078125, %v2888_v14  ;;  %v2894_v15 = vmul.f32 %v5392_v10, %v5392_v10  ;;  %v2950_v6 = vrot.slane %v2941_v4, %v2949_v2 }
 0xd8c   : > { %v5396_v13 = vsub.f32 %v2882_v5, %v2891_v12  ;;  %2896 = vadd.xlane.f32.xlu0 %v2894_v15 }
 0xd8e   : > { %v2895_v17 = vmul.f32 %v5396_v13, %v5396_v13 }
 0xd90   : > { %2898 = vadd.xlane.f32.xlu1 %v2895_v17 }
 0xe15   : > { %v2897_v41 = vpop.xlane.xlu0 %2896 }
 0xe16   : > { %v2900_v42 = vmul.f32 0.0078125, %v2897_v41 }
 0xe18   : > { %v2902_v43 = vadd.f32 1e-05, %v2900_v42 }
 0xe19   : > { %v2899_v44 = vpop.xlane.xlu1 %2898 }
 0xe1a   : > { %4520 = vrsqrt.f32 %v2902_v43  ;;  %v2901_v45 = vmul.f32 0.0078125, %v2899_v44 }
 0xe1c   : > { %v2903_v46 = vadd.f32 1e-05, %v2901_v45 }
 0xe1e   : > { %4522 = vrsqrt.f32 %v2903_v46 }
 0xe27   : > { %v4521_v47 = vpop.eup %4520 }
 0xe28   : > { %v2906_v48 = vmul.f32 %v4521_v47, %v5392_v10  ;;  %v3772_v47 = vld [vmem:[%s5580_s16] ss:$0 sm:$0xff] }
 0xe2a   : > { %v2914_v52 = vmul.f32 %v3737_v49, %v2906_v48 }
 0xe2b   : > { %v4523_v50 = vpop.eup %4522 }
 0xe2c   : > { %v2907_v51 = vmul.f32 %v4523_v50, %v5396_v13  ;;  %v2922_v55 = vadd.f32 %v3738_v53, %v2914_v52 }
 0xe2e   : > { %v2915_v54 = vmul.f32 %v3737_v49, %v2907_v51  ;;  %v3773_v49 = vld [vmem:[%s5581_s17] ss:$0 sm:$0xff] }
 0xe30   : > { %v2923_v56 = vadd.f32 %v3738_v53, %v2915_v54 }
 0xe32   : > { %v2924_v57 = vpack.c.bf16 %v2923_v56, %v2922_v55 }
 0xe34   : > { %3066 = vmatmul.mubr.bf16.vlgmr.msra.gmra.mxu0 %v2924_v57 }
 0xef4   : > { %v3067_v5 = vpop.f32.mrf.mxu0 }
 0xef5   : > { %v3068_v12 = vadd.f32 %v3067_v5, %v2946_v7 }
 0xef6   : > { %v3069_v8 = vpop.f32.mrf.mxu0 }
 0xef7   : > { %v3070_v10 = vadd.f32 %v3069_v8, %v2950_v6  ;;  %v3076_v21 = vmax.f32 %v3068_v12, 0.0 }
 0xef8   : > { %v3071_v9 = vpop.f32.mrf.mxu0 }
 0xef9   : > { %v3072_v14 = vadd.f32 %v3071_v9, %v2946_v7  ;;  %v3077_v18 = vmax.f32 %v3070_v10, 0.0 }
 0xefa   : > { %v3073_v15 = vpop.f32.mrf.mxu0 }
 0xefb   : > { %v3074_v13 = vadd.f32 %v3073_v15, %v2950_v6  ;;  %v3078_v17 = vmax.f32 %v3072_v14, 0.0 }
 0xefd   : > { %v3079_v19 = vmax.f32 %v3074_v13, 0.0  ;;  %v3080_v23 = vpack.c.bf16 %v3078_v17, %v3076_v21 }
 0xeff   : > { %v3081_v11 = vpack.c.bf16 %v3079_v19, %v3077_v18 }
 0xf01   : > { %3249 = vmatprep.mubr.bf16.mxu1 %v3081_v11 }
 0xf02   : > { %3250 = vmatmul.mubr.bf16.vlgmr.msra.gmra.mxu1 %v3080_v23 }
 0xfc2   : > { %v3950_v24 = vpop.f32.mrf.mxu1 }
 0xfc4   : > { %v3951_v26 = vpop.f32.mrf.mxu1 }
 0xfc5   : > { %v3952_v16 = vadd.f32 %v3951_v26, %v3950_v24 }
 0xfc6   : > { %v3953_v27 = vpop.f32.mrf.mxu1 }
 0xfc7   : > { %v3252_v28 = vadd.f32 %v3952_v16, %v3755_v25 }
 0xfc8   : > { %v3954_v20 = vpop.f32.mrf.mxu1 }
 0xfc9   : > { %v3955_v29 = vadd.f32 %v3954_v20, %v3953_v27  ;;  %v3258_v22 = vadd.f32 %v3252_v28, %v2922_v55 }
 0xfcb   : > { %v3255_v30 = vadd.f32 %v3955_v29, %v3755_v25  ;;  %3262 = vadd.xlane.f32.xlu0 %v3258_v22 }
 0xfcd   : > { %v3259_v31 = vadd.f32 %v3255_v30, %v2923_v56 }
 0xfcf   : > { %3264 = vadd.xlane.f32.xlu1 %v3259_v31 }
0x1054   : > { %v3263_v32 = vpop.xlane.xlu0 %3262 }
0x1055   : > { %v3266_v33 = vmul.f32 0.0078125, %v3263_v32 }
0x1057   : > { %v3268_v34 = vsub.f32 %v3258_v22, %v3266_v33 }
0x1058   : > { %v3265_v35 = vpop.xlane.xlu1 %3264 }
0x1059   : > { %v3267_v36 = vmul.f32 0.0078125, %v3265_v35  ;;  %v3270_v37 = vmul.f32 %v3268_v34, %v3268_v34 }
0x105b   : > { %v3269_v38 = vsub.f32 %v3259_v31, %v3267_v36  ;;  %3272 = vadd.xlane.f32.xlu0 %v3270_v37 }
0x105d   : > { %v3271_v39 = vmul.f32 %v3269_v38, %v3269_v38 }
0x105f   : > { %3274 = vadd.xlane.f32.xlu1 %v3271_v39 }
0x10e4   : > { %v3273_v40 = vpop.xlane.xlu0 %3272 }
0x10e5   : > { %v3276_v41 = vmul.f32 0.0078125, %v3273_v40 }
0x10e7   : > { %v3278_v42 = vadd.f32 1e-05, %v3276_v41 }
0x10e8   : > { %v3275_v43 = vpop.xlane.xlu1 %3274 }
0x10e9   : > { %4524 = vrsqrt.f32 %v3278_v42  ;;  %v3277_v44 = vmul.f32 0.0078125, %v3275_v43 }
0x10eb   : > { %v3279_v45 = vadd.f32 1e-05, %v3277_v44 }
0x10ed   : > { %4526 = vrsqrt.f32 %v3279_v45 }
0x10f6   : > { %v4525_v46 = vpop.eup %4524 }
0x10f7   : > { %v3282_v48 = vmul.f32 %v4525_v46, %v3268_v34 }
0x10f9   : > { %v3290_v50 = vmul.f32 %v3772_v47, %v3282_v48 }
0x10fa   : > { %v4527_v51 = vpop.eup %4526 }
0x10fb   : > { %v3283_v52 = vmul.f32 %v4527_v51, %v3269_v38  ;;  %v3298_v53 = vadd.f32 %v3773_v49, %v3290_v50 }
0x10fd   : > { %v3291_v54 = vmul.f32 %v3772_v47, %v3283_v52  ;;  %3300 = vst [vmem:[%s608_s0] sm:$0xff] %v3298_v53 }
0x10ff   : > { %v3299_v55 = vadd.f32 %v3773_v49, %v3291_v54 }
0x1101   : > { %3301 = vst [vmem:[%s608_s0 + $0x8] sm:$0xff] %v3299_v55 }
0x1102   : > { %4541 = shalt.err (!%p4538_p5)
}
0x1103   : > { %s4542_s21 = scalar_lea.hbm %s5515_s20, 256  ;;  %s4546_s0 = scalar_lea.hbm %s5582_s18, 512 }
0x1104   : > { %p4543_p6 = scmp.ne.s32.totalorder %s5515_s20, %s4542_s21  ;;  %p4547_p10 = scmp.lt.s32.totalorder %s5515_s20, %s5582_s18 }
0x1105   : > { %p4548_p11 = scmp.lt.s32.totalorder %s4546_s0, %s4542_s21 }
0x1106   : > { %p4544_p7 = pnand %p4543_p6, %p4747_p4 }
0x1107   : > { %p4549_p12 = por %p4548_p11, %p4547_p10 }
0x1108   : > { %p4545_p9 = pneg %p4544_p7 }
0x110a   : > { %p4550_p13 = pnand %p4549_p12, %p4545_p9 }
0x110c   : > { %4553 = shalt.err (!%p4550_p13)
}
0x110d   : > { %s4610_s22 = smov 128   ;;  %s4611_s30 = smov 8  }
0x110e   : > { %4276 = dma.vmem_to_hbm [thread:$0]  (%p4747_p4), %s5517_s1, 256, %s5515_s20, %s5519_s23, %s4610_s22, %s4610_s22, %s4611_s30  }
0x110f PF: > { %s5608_s26 = sld [smem:[#allocation10_spill]] }
0x1110   : > { %s5609_s29 = sld [smem:[#allocation7_spill]] }
0x1115   : > { %p4282_p0 = scmp.ge.s32.totalorder %s5608_s26, 2 }
0x1116   : > { %s3333_s3 = sand.u32 1, %s5609_s29  }
0x1117   : > { %p4279_p1 = pnand %p4282_p0, %p4754_p8  ;;  %s3334_s21 = scalar_lea.sflag [#allocation5], %s3333_s3 }
0x1119   : > { %p4280_p2 = pneg %p4279_p1 }
0x111b   : > { %4579 = dma.done.wait (%p4280_p2), %s3334_s21, 256  }
0x111c   : > { %4581 = vsyncadd (%p4280_p2), %s3334_s21, 4294967040  ;;  %s31_s19 = sadd.s32 1, %s5608_s26   ;;  %s5611_s0 = sld [smem:[#allocation8_spill]] }
0x111d   : > { %p28_p3 = scmp.ge.s32.totalorder %s31_s19, 4   ;;  %s5612_s29 = sld [smem:[#allocation13_spill]] }
0x111e   : > { %s5613_s30 = sld [smem:[#allocation9_spill]]  ;;  %s5615_s27 = smov %s4588_s28 }
0x111f   : > { %s5614_s2 = sld [smem:[#allocation11_spill]] }
0x1121   :  { %30 = sbr.rel (!%p28_p3) target bundleno = 9 (0x9), region = 167 }
0x1122   : > { %s5616_s28 = smov %s5611_s0 }
0x1125   : > { %s5617_s0 = smov %s5614_s2 }
0x1126   :  { %3339 = vsyncpa [#allocation5], 1 }
0x1127   :  { %3341 = vsyncpa [#allocation5 + $0x1], 1 }

</bundles_post_ra>
